<compile_context>
chip_gen: v7x
topology: tpu7x:2x2x1
jax: 0.10.0
libtpu: 0.0.40
codegen_flags: <defaults>
</compile_context>

<pallas_src>
import math

import numpy as np
import jax
import jax.numpy as jnp
from jax.experimental import pallas as pl
from jax.experimental.pallas import tpu as pltpu


# ---------------------------------------------------------------------------
# Fused kernel factory: one grid step == B images, all 6 layers.
# Row layout of every activation: row = m * B + b (spatial row m major, image
# b within the tile minor).  Column layout: (w, c) flattened, c fastest,
# zero-padded to a multiple of 128.
# ---------------------------------------------------------------------------
def _make_kernel(B):
    f32 = jnp.float32

    def kernel(x_ref, w1, b1, w2, b2, w3, b3, w4, b4, w5, b5,
               w6e, w6o, w6e2, b6, o_ref, buf1, buf3, buf4, buf5):
        def mm(a, w):
            return jnp.dot(a, w, preferred_element_type=jnp.float32)

        def relu(v):
            return jnp.maximum(v, 0.0)

        # ---- Layer 1: Conv2d(1, 32, 3, s=2, p=1), 16x16 -> 8x8 ------------
        # x_ref[0] rows: [even-phase LHS (4B), odd-phase LHS (4B)]; each row
        # holds the three vertical taps fused along K (3 * 16 = 48 cols), so
        # the whole layer is one GEMM.
        a1 = relu(mm(x_ref[0, :, :], w1[...]) + b1[...])           # (8B, 256)
        # buf1[m*B+b] = O1[m-1]: zero guard block then O1[0..2].
        buf1[0:B, :] = jnp.zeros((B, 256), f32)
        buf1[B:4 * B, :] = a1[4 * B:7 * B, :]

        # ---- Layer 2: Conv2d(32, 16, 3, s=2, p=1), 8x8 -> 4x4 -------------
        # out row m reads layer-1 rows {2m-1, 2m, 2m+1} = {O1[m-1], E1[m], O1[m]}
        a2 = relu(mm(buf1[0:4 * B, :], w2[0]) +
                  mm(a1[0:4 * B, :], w2[1]) +
                  mm(a1[4 * B:8 * B, :], w2[2]) + b2[...])         # (4B, 128)

        # ---- Layer 3: Conv2d(16, 8, 3), 4x4 -> 2x2 -------------------------
        # out row m reads layer-2 rows {m, m+1, m+2}.
        a3 = relu(mm(a2[0:2 * B, :], w3[0]) +
                  mm(a2[B:3 * B, :], w3[1]) +
                  mm(a2[2 * B:4 * B, :], w3[2]) + b3[...])         # (2B, 128)
        # buf3 = zero-extended layer-3 rows: [0 (2B), a3 (2B), 0 (2B)].
        buf3[0:2 * B, :] = jnp.zeros((2 * B, 128), f32)
        buf3[2 * B:4 * B, :] = a3
        buf3[4 * B:6 * B, :] = jnp.zeros((2 * B, 128), f32)

        # ---- Layer 4: ConvTranspose2d(8, 16, 3), 2x2 -> 4x4 ----------------
        # out row m gets tap kh from input row (m - kh); ext[j] = a3[j-2].
        a4 = relu(mm(buf3[2 * B:6 * B, :], w4[0]) +
                  mm(buf3[B:5 * B, :], w4[1]) +
                  mm(buf3[0:4 * B, :], w4[2]) + b4[...])           # (4B, 128)
        # buf4[m*B+b] = A4[m+1]: A4[1..3] then a zero guard block.
        buf4[0:3 * B, :] = a4[B:4 * B, :]
        buf4[3 * B:4 * B, :] = jnp.zeros((B, 128), f32)

        # ---- Layer 5: ConvTranspose2d(16, 32, 3, s=2, p=1, op=1), 4x4 -> 8x8
        # even out rows (2m):   tap kh=1 from input row m
        # odd  out rows (2m+1): tap kh=2 from row m, tap kh=0 from row m+1
        e5 = relu(mm(a4, w5[1]) + b5[...])                         # (4B, 256)
        o5 = relu(mm(a4, w5[2]) + mm(buf4[0:4 * B, :], w5[0]) + b5[...])
        # buf5[m*B+b] = E5[m+1]: E5[1..3] then a zero guard block.
        buf5[0:3 * B, :] = e5[B:4 * B, :]
        buf5[3 * B:4 * B, :] = jnp.zeros((B, 256), f32)

        # ---- Layer 6: ConvTranspose2d(32, 1, 3, s=2, p=1, op=1), 8x8 -> 16x16
        # The four output row phases (true row = 4m + p) are packed along the
        # lane axis (cols p*16 .. p*16+15) by column-shifted weights, so the
        # layer is three GEMMs into one lane-dense (4B, 128) slab.
        y = jax.nn.sigmoid(mm(e5, w6e[...]) +
                           mm(o5, w6o[...]) +
                           mm(buf5[0:4 * B, :], w6e2[...]) + b6[...])
        o_ref[0, :, :] = y

    return kernel


# ---------------------------------------------------------------------------
# Host-side (numpy) weight packing: per-vertical-tap dense GEMM matrices that
# encode the horizontal (kw) taps and the channel mixing of each layer.
# Column index convention: in = iw*Cin + ci, out = ow*Cout + co.
# ---------------------------------------------------------------------------
def _pack_conv(w, b, stride, pad, w_in, w_out, k_in, k_out):
    """Conv2d weight (Cout,Cin,KH,KW) -> A (KH,k_in,k_out), bias (1,k_out)."""
    w = np.asarray(w, np.float32)
    b = np.asarray(b, np.float32)
    c_out, c_in, kh_n, kw_n = w.shape
    A = np.zeros((kh_n, k_in, k_out), np.float32)
    for kh in range(kh_n):
        for ow in range(w_out):
            for kw in range(kw_n):
                iw = stride * ow - pad + kw
                if 0 <= iw < w_in:
                    A[kh, iw * c_in:(iw + 1) * c_in,
                      ow * c_out:(ow + 1) * c_out] = w[:, :, kh, kw].T
    bias = np.zeros((1, k_out), np.float32)
    for ow in range(w_out):
        bias[0, ow * c_out:(ow + 1) * c_out] = b
    return A, bias


def _pack_convt(w, b, stride, pad, w_in, w_out, k_in, k_out):
    """ConvTranspose2d weight (Cin,Cout,KH,KW) -> A (KH,k_in,k_out), bias."""
    w = np.asarray(w, np.float32)
    b = np.asarray(b, np.float32)
    c_in, c_out, kh_n, kw_n = w.shape
    A = np.zeros((kh_n, k_in, k_out), np.float32)
    for kh in range(kh_n):
        for iw in range(w_in):
            for kw in range(kw_n):
                ow = stride * iw - pad + kw
                if 0 <= ow < w_out:
                    A[kh, iw * c_in:(iw + 1) * c_in,
                      ow * c_out:(ow + 1) * c_out] = w[:, :, kh, kw]
    bias = np.zeros((1, k_out), np.float32)
    for ow in range(w_out):
        bias[0, ow * c_out:(ow + 1) * c_out] = b
    return A, bias


def pack_params(params):
    a1, bias1 = _pack_conv(params["w1"], params["b1"], 2, 1, 16, 8, 16, 256)
    w1 = a1.reshape(48, 256)                     # 3 vertical taps fused along K
    w2, bias2 = _pack_conv(params["w2"], params["b2"], 2, 1, 8, 4, 256, 128)
    w3, bias3 = _pack_conv(params["w3"], params["b3"], 1, 0, 4, 2, 128, 128)
    w4, bias4 = _pack_convt(params["w4"], params["b4"], 1, 0, 2, 4, 128, 128)
    w5, bias5 = _pack_convt(params["w5"], params["b5"], 2, 1, 4, 8, 128, 256)
    a6, bias6 = _pack_convt(params["w6"], params["b6"], 2, 1, 8, 16, 256, 16)

    # Layer-6 lane packing of the 4 output row phases (true row = 4m + p):
    #   p=0: E5[m]   @ tap1          p=1: O5[m] @ tap0 + E5[m]   @ tap2
    #   p=2: O5[m]   @ tap1          p=3: O5[m] @ tap2 + E5[m+1] @ tap0
    w6e = np.zeros((256, 128), np.float32)
    w6o = np.zeros((256, 128), np.float32)
    w6e2 = np.zeros((256, 128), np.float32)
    w6e[:, 0:16] = a6[1]
    w6e[:, 16:32] = a6[2]
    w6o[:, 16:32] = a6[0]
    w6o[:, 32:48] = a6[1]
    w6o[:, 48:64] = a6[2]
    w6e2[:, 48:64] = a6[0]
    bias6p = np.zeros((1, 128), np.float32)
    for p in range(4):
        bias6p[0, p * 16:(p + 1) * 16] = bias6[0]

    arrs = (w1, bias1, w2, bias2, w3, bias3, w4, bias4, w5, bias5,
            w6e, w6o, w6e2, bias6p)
    return tuple(jnp.asarray(a) for a in arrs)


# ---------------------------------------------------------------------------
# Wrapper: batch tiling, layer-1 LHS construction (tap fusion along K), fused
# kernel call, output de-interleave.
# ---------------------------------------------------------------------------
def _round_up(v, m):
    return ((v + m - 1) // m) * m


def _choose_batch_tile(n):
    # Keep >= 2 grid steps when the batch allows (v7x has 2 TensorCores); keep
    # the tile a multiple of 8 so all in-kernel slices stay sublane-aligned.
    if n >= 256:
        return 128
    if n >= 16:
        return _round_up((n + 1) // 2, 8)
    return _round_up(max(n, 1), 8)


def forward_pallas(x_nchw, packed):
    n = x_nchw.shape[0]
    bt = _choose_batch_tile(n)
    g = -(-n // bt)
    n_pad = g * bt

    img = x_nchw[:, 0, :, :].astype(jnp.float32)                  # (N, 16, 16)
    if n_pad != n:
        img = jnp.concatenate(
            [img, jnp.zeros((n_pad - n, 16, 16), jnp.float32)], axis=0)

    # Layer-1 LHS (built in XLA): per image and per output row-phase, the
    # three vertical taps fused along K (3 rows x 16 pixels = 48 cols).
    imgr = img.reshape(g, bt, 4, 4, 16)          # [..., m, k, w]: image row 4m+k
    p0 = imgr[:, :, :, 0, :]
    p1 = imgr[:, :, :, 1, :]
    p2 = imgr[:, :, :, 2, :]
    p3 = imgr[:, :, :, 3, :]
    p3m = jnp.concatenate(
        [jnp.zeros_like(p3[:, :, :1, :]), p3[:, :, :3, :]], axis=2)   # P3[m-1]
    even_lhs = jnp.concatenate([p3m, p0, p1], axis=-1)   # -> output rows 2m
    odd_lhs = jnp.concatenate([p1, p2, p3], axis=-1)     # -> output rows 2m+1
    lhs = jnp.concatenate([even_lhs, odd_lhs], axis=2)   # (G, B, 8, 48)
    lhs = lhs.transpose(0, 2, 1, 3).reshape(g, 8 * bt, 48)

    kernel = _make_kernel(bt)
    in_specs = [pl.BlockSpec((1, 8 * bt, 48), lambda i: (i, 0, 0))]
    for arr in packed:
        if arr.ndim == 3:
            in_specs.append(pl.BlockSpec(arr.shape, lambda i: (0, 0, 0)))
        else:
            in_specs.append(pl.BlockSpec(arr.shape, lambda i: (0, 0)))

    out = pl.pallas_call(
        kernel,
        out_shape=jax.ShapeDtypeStruct((g, 4 * bt, 128), jnp.float32),
        grid=(g,),
        in_specs=in_specs,
        out_specs=pl.BlockSpec((1, 4 * bt, 128), lambda i: (i, 0, 0)),
        scratch_shapes=[
            pltpu.VMEM((4 * bt, 256), jnp.float32),   # buf1: O1 shifted (+ zero guard)
            pltpu.VMEM((6 * bt, 128), jnp.float32),   # buf3: layer-3 out, zero-extended
            pltpu.VMEM((4 * bt, 128), jnp.float32),   # buf4: A4 shifted (+ zero guard)
            pltpu.VMEM((4 * bt, 256), jnp.float32),   # buf5: E5 shifted (+ zero guard)
        ],
        compiler_params=pltpu.CompilerParams(
            dimension_semantics=("parallel",),
            vmem_limit_bytes=48 * 1024 * 1024,
        ),
    )(lhs, *packed)

    # kernel row m*B + b, col p*16 + w  ->  image b, output row 4m + p, col w
    y = out[:, :, :64].reshape(g, 4, bt, 4, 16)
    y = y.transpose(0, 2, 1, 3, 4).reshape(n_pad, 16, 16)[:n]
    return y[:, None, :, :]                                        # (N,1,16,16)


# ---------------------------------------------------------------------------
# Pure-JAX reference (PyTorch semantics) for correctness checking.
# ---------------------------------------------------------------------------
def _apply_act(x, activation):
    if activation == "relu":
        return jnp.maximum(x, 0.0)
    if activation == "sigmoid":
        return jax.nn.sigmoid(x)
    return x


def _extract_patches(x, kh, kw, stride):
    n, h, w, c = x.shape
    hout = (h - kh) // stride + 1
    wout = (w - kw) // stride + 1
    pieces = []
    for i in range(kh):
        for j in range(kw):
            pieces.append(
                x[:, i:i + stride * hout:stride, j:j + stride * wout:stride, :])
    return jnp.concatenate(pieces, axis=-1)


def conv2d_ref(x, w_oihw, b, stride, padding, activation):
    cout, cin, kh, kw = w_oihw.shape
    w_hwio = jnp.transpose(w_oihw, (2, 3, 1, 0))
    if padding:
        x = jnp.pad(x, ((0, 0), (padding, padding), (padding, padding), (0, 0)))
    n, h, w, c = x.shape
    hout = (h - kh) // stride + 1
    wout = (w - kw) // stride + 1
    patches = _extract_patches(x, kh, kw, stride).reshape(n * hout * wout, kh * kw * c)
    wm = w_hwio.reshape(kh * kw * c, cout)
    y = _apply_act(patches @ wm + b.reshape(1, cout), activation)
    return y.reshape(n, hout, wout, cout)


def conv_transpose2d_ref(x, w_iohw, b, stride, padding, output_padding, activation):
    cin, cout, kh, kw = w_iohw.shape
    w_oihw = jnp.transpose(jnp.flip(w_iohw, axis=(2, 3)), (1, 0, 2, 3))
    n, h, w, c = x.shape
    if stride > 1:
        xd = jnp.zeros((n, (h - 1) * stride + 1, (w - 1) * stride + 1, c), x.dtype)
        xd = xd.at[:, ::stride, ::stride, :].set(x)
    else:
        xd = x
    lo = kh - 1 - padding
    hi = kh - 1 - padding + output_padding
    xd = jnp.pad(xd, ((0, 0), (lo, hi), (lo, hi), (0, 0)))
    return conv2d_ref(xd, w_oihw, b, 1, 0, activation)


def forward_ref(x_nchw, params):
    x = jnp.transpose(x_nchw, (0, 2, 3, 1))
    x = conv2d_ref(x, params["w1"], params["b1"], 2, 1, "relu")
    x = conv2d_ref(x, params["w2"], params["b2"], 2, 1, "relu")
    x = conv2d_ref(x, params["w3"], params["b3"], 1, 0, "relu")
    x = conv_transpose2d_ref(x, params["w4"], params["b4"], 1, 0, 0, "relu")
    x = conv_transpose2d_ref(x, params["w5"], params["b5"], 2, 1, 1, "relu")
    x = conv_transpose2d_ref(x, params["w6"], params["b6"], 2, 1, 1, "sigmoid")
    return jnp.transpose(x, (0, 3, 1, 2))


# ---------------------------------------------------------------------------
# Deterministic parameter init (PyTorch-style uniform bounds, synthetic)
# ---------------------------------------------------------------------------
def init_params(key):
    def uni(k, shape, bound):
        return jax.random.uniform(k, shape, jnp.float32, -bound, bound)

    keys = jax.random.split(key, 12)
    params = {}
    conv_cfg = [("1", 32, 1, 3), ("2", 16, 32, 3), ("3", 8, 16, 3)]
    i = 0
    for name, cout, cin, k in conv_cfg:
        bound = 1.0 / math.sqrt(cin * k * k)
        params["w" + name] = uni(keys[i], (cout, cin, k, k), bound)
        params["b" + name] = uni(keys[i + 1], (cout,), bound)
        i += 2
    convt_cfg = [("4", 8, 16, 3), ("5", 16, 32, 3), ("6", 32, 1, 3)]
    for name, cin, cout, k in convt_cfg:
        bound = 1.0 / math.sqrt(cout * k * k)
        params["w" + name] = uni(keys[i], (cin, cout, k, k), bound)
        params["b" + name] = uni(keys[i + 1], (cout,), bound)
        i += 2
    return params


# TODO(synk): nn.MaxPool2d(2, 2) is declared by the module but unused in
# forward(), so it is intentionally not implemented.

if __name__ == "__main__":
    key = jax.random.PRNGKey(0)
    k_params, k_x = jax.random.split(key)
    params = init_params(k_params)
    packed = pack_params(params)

    fwd = jax.jit(forward_pallas)
    ref = jax.jit(forward_ref)

    # Single-channel 16x16 images -> 2x2 bottleneck -> reconstructed 16x16.
    x = jax.random.uniform(k_x, (2, 1, 16, 16), jnp.float32)
    y = fwd(x, packed)
    jax.block_until_ready(y)
    assert y.shape == (2, 1, 16, 16), y.shape
    err = float(jnp.max(jnp.abs(y - ref(x, params))))
    assert err < 1e-3, f"Pallas mismatch vs reference: max abs err {err}"

    # Exercise the batched multi-tile path (batch padding + 2-step parallel grid).
    x2 = jax.random.uniform(jax.random.PRNGKey(1), (20, 1, 16, 16), jnp.float32)
    y2 = fwd(x2, packed)
    jax.block_until_ready(y2)
    err2 = float(jnp.max(jnp.abs(y2 - ref(x2, params))))
    assert err2 < 1e-3, f"Pallas mismatch (batched) vs reference: max abs err {err2}"

    print("KERNEL_OK")
</pallas_src>

<mosaic_0001>
module attributes {stable_mosaic.version = 11 : i64} {
  func.func @kernel(%arg0: i32, %arg1: memref<1x64x48xf32, #tpu.memory_space<vmem>>, %arg2: memref<48x256xf32, #tpu.memory_space<vmem>>, %arg3: memref<1x256xf32, #tpu.memory_space<vmem>>, %arg4: memref<3x256x128xf32, #tpu.memory_space<vmem>>, %arg5: memref<1x128xf32, #tpu.memory_space<vmem>>, %arg6: memref<3x128x128xf32, #tpu.memory_space<vmem>>, %arg7: memref<1x128xf32, #tpu.memory_space<vmem>>, %arg8: memref<3x128x128xf32, #tpu.memory_space<vmem>>, %arg9: memref<1x128xf32, #tpu.memory_space<vmem>>, %arg10: memref<3x128x256xf32, #tpu.memory_space<vmem>>, %arg11: memref<1x256xf32, #tpu.memory_space<vmem>>, %arg12: memref<256x128xf32, #tpu.memory_space<vmem>>, %arg13: memref<256x128xf32, #tpu.memory_space<vmem>>, %arg14: memref<256x128xf32, #tpu.memory_space<vmem>>, %arg15: memref<1x128xf32, #tpu.memory_space<vmem>>, %arg16: memref<1x32x128xf32, #tpu.memory_space<vmem>>, %arg17: memref<32x256xf32, #tpu.memory_space<vmem>>, %arg18: memref<48x128xf32, #tpu.memory_space<vmem>>, %arg19: memref<32x128xf32, #tpu.memory_space<vmem>>, %arg20: memref<32x256xf32, #tpu.memory_space<vmem>>) attributes {dimension_semantics = [#tpu.dimension_semantics<parallel>], iteration_bounds = array<i64: 1>, scalar_prefetch = 0 : i64, scratch_operands = 4 : i64, tpu.core_type = #tpu.core_type<tc>, window_params = [{transform_indices = @transform_0, window_bounds = array<i64: 1, 64, 48>}, {pipeline_mode = #tpu.pipeline_mode<synchronous>, transform_indices = @transform_1, window_bounds = array<i64: 48, 256>}, {pipeline_mode = #tpu.pipeline_mode<synchronous>, transform_indices = @transform_2, window_bounds = array<i64: 1, 256>}, {pipeline_mode = #tpu.pipeline_mode<synchronous>, transform_indices = @transform_3, window_bounds = array<i64: 3, 256, 128>}, {pipeline_mode = #tpu.pipeline_mode<synchronous>, transform_indices = @transform_4, window_bounds = array<i64: 1, 128>}, {pipeline_mode = #tpu.pipeline_mode<synchronous>, transform_indices = @transform_5, window_bounds = array<i64: 3, 128, 128>}, {pipeline_mode = #tpu.pipeline_mode<synchronous>, transform_indices = @transform_6, window_bounds = array<i64: 1, 128>}, {pipeline_mode = #tpu.pipeline_mode<synchronous>, transform_indices = @transform_7, window_bounds = array<i64: 3, 128, 128>}, {pipeline_mode = #tpu.pipeline_mode<synchronous>, transform_indices = @transform_8, window_bounds = array<i64: 1, 128>}, {pipeline_mode = #tpu.pipeline_mode<synchronous>, transform_indices = @transform_9, window_bounds = array<i64: 3, 128, 256>}, {pipeline_mode = #tpu.pipeline_mode<synchronous>, transform_indices = @transform_10, window_bounds = array<i64: 1, 256>}, {pipeline_mode = #tpu.pipeline_mode<synchronous>, transform_indices = @transform_11, window_bounds = array<i64: 256, 128>}, {pipeline_mode = #tpu.pipeline_mode<synchronous>, transform_indices = @transform_12, window_bounds = array<i64: 256, 128>}, {pipeline_mode = #tpu.pipeline_mode<synchronous>, transform_indices = @transform_13, window_bounds = array<i64: 256, 128>}, {pipeline_mode = #tpu.pipeline_mode<synchronous>, transform_indices = @transform_14, window_bounds = array<i64: 1, 128>}, {transform_indices = @transform_15, window_bounds = array<i64: 1, 32, 128>}]} {
    %c0 = arith.constant 0 : index
    %c0_0 = arith.constant 0 : index
    %c0_1 = arith.constant 0 : index
    %0 = vector.load %arg1[%c0, %c0_0, %c0_1] : memref<1x64x48xf32, #tpu.memory_space<vmem>>, vector<1x64x48xf32>
    %1 = vector.shape_cast %0 : vector<1x64x48xf32> to vector<64x48xf32>
    %c0_2 = arith.constant 0 : index
    %c0_3 = arith.constant 0 : index
    %2 = vector.load %arg2[%c0_2, %c0_3] : memref<48x256xf32, #tpu.memory_space<vmem>>, vector<48x256xf32>
    %cst = arith.constant dense<0.000000e+00> : vector<64x256xf32>
    %3 = tpu.matmul %1, %2, %cst {dimension_numbers = #tpu.dot_dimension_numbers<[1], [0], [0], [1], [0, 0, 1, 1], [], []>} : vector<64x48xf32>, vector<48x256xf32>, vector<64x256xf32> -> vector<64x256xf32>
    %c0_4 = arith.constant 0 : index
    %c0_5 = arith.constant 0 : index
    %4 = vector.load %arg3[%c0_4, %c0_5] : memref<1x256xf32, #tpu.memory_space<vmem>>, vector<1x256xf32>
    %5 = vector.broadcast %4 : vector<1x256xf32> to vector<64x256xf32>
    %6 = arith.addf %3, %5 : vector<64x256xf32>
    %cst_6 = arith.constant 0.000000e+00 : f32
    %7 = vector.broadcast %cst_6 : f32 to vector<64x256xf32>
    %8 = arith.maximumf %6, %7 : vector<64x256xf32>
    %cst_7 = arith.constant 0.000000e+00 : f32
    %9 = vector.broadcast %cst_7 : f32 to vector<8x256xf32>
    %c0_8 = arith.constant 0 : index
    %c0_9 = arith.constant 0 : index
    %10 = vector.load %arg17[%c0_8, %c0_9] : memref<32x256xf32, #tpu.memory_space<vmem>>, vector<8x256xf32>
    tpu.vector_store %arg17[%c0_8, %c0_9], %9 {strides = array<i32>} : memref<32x256xf32, #tpu.memory_space<vmem>>, vector<8x256xf32>,
    %11 = vector.extract_strided_slice %8 {offsets = [32, 0], sizes = [24, 256], strides = [1, 1]} : vector<64x256xf32> to vector<24x256xf32>
    %c8 = arith.constant 8 : index
    %c0_10 = arith.constant 0 : index
    %12 = vector.load %arg17[%c8, %c0_10] : memref<32x256xf32, #tpu.memory_space<vmem>>, vector<24x256xf32>
    tpu.vector_store %arg17[%c8, %c0_10], %11 {strides = array<i32>} : memref<32x256xf32, #tpu.memory_space<vmem>>, vector<24x256xf32>,
    %c0_11 = arith.constant 0 : index
    %c0_12 = arith.constant 0 : index
    %13 = vector.load %arg17[%c0_11, %c0_12] : memref<32x256xf32, #tpu.memory_space<vmem>>, vector<32x256xf32>
    %c0_13 = arith.constant 0 : index
    %c0_14 = arith.constant 0 : index
    %c0_15 = arith.constant 0 : index
    %14 = vector.load %arg4[%c0_13, %c0_14, %c0_15] : memref<3x256x128xf32, #tpu.memory_space<vmem>>, vector<1x256x128xf32>
    %15 = vector.shape_cast %14 : vector<1x256x128xf32> to vector<256x128xf32>
    %cst_16 = arith.constant dense<0.000000e+00> : vector<32x128xf32>
    %16 = tpu.matmul %13, %15, %cst_16 {dimension_numbers = #tpu.dot_dimension_numbers<[1], [0], [0], [1], [0, 0, 1, 1], [], []>} : vector<32x256xf32>, vector<256x128xf32>, vector<32x128xf32> -> vector<32x128xf32>
    %17 = vector.extract_strided_slice %8 {offsets = [0, 0], sizes = [32, 256], strides = [1, 1]} : vector<64x256xf32> to vector<32x256xf32>
    %c1 = arith.constant 1 : index
    %c0_17 = arith.constant 0 : index
    %c0_18 = arith.constant 0 : index
    %18 = vector.load %arg4[%c1, %c0_17, %c0_18] : memref<3x256x128xf32, #tpu.memory_space<vmem>>, vector<1x256x128xf32>
    %19 = vector.shape_cast %18 : vector<1x256x128xf32> to vector<256x128xf32>
    %cst_19 = arith.constant dense<0.000000e+00> : vector<32x128xf32>
    %20 = tpu.matmul %17, %19, %cst_19 {dimension_numbers = #tpu.dot_dimension_numbers<[1], [0], [0], [1], [0, 0, 1, 1], [], []>} : vector<32x256xf32>, vector<256x128xf32>, vector<32x128xf32> -> vector<32x128xf32>
    %21 = arith.addf %16, %20 : vector<32x128xf32>
    %22 = vector.extract_strided_slice %8 {offsets = [32, 0], sizes = [32, 256], strides = [1, 1]} : vector<64x256xf32> to vector<32x256xf32>
    %c2 = arith.constant 2 : index
    %c0_20 = arith.constant 0 : index
    %c0_21 = arith.constant 0 : index
    %23 = vector.load %arg4[%c2, %c0_20, %c0_21] : memref<3x256x128xf32, #tpu.memory_space<vmem>>, vector<1x256x128xf32>
    %24 = vector.shape_cast %23 : vector<1x256x128xf32> to vector<256x128xf32>
    %cst_22 = arith.constant dense<0.000000e+00> : vector<32x128xf32>
    %25 = tpu.matmul %22, %24, %cst_22 {dimension_numbers = #tpu.dot_dimension_numbers<[1], [0], [0], [1], [0, 0, 1, 1], [], []>} : vector<32x256xf32>, vector<256x128xf32>, vector<32x128xf32> -> vector<32x128xf32>
    %26 = arith.addf %21, %25 : vector<32x128xf32>
    %c0_23 = arith.constant 0 : index
    %c0_24 = arith.constant 0 : index
    %27 = vector.load %arg5[%c0_23, %c0_24] : memref<1x128xf32, #tpu.memory_space<vmem>>, vector<1x128xf32>
    %28 = vector.broadcast %27 : vector<1x128xf32> to vector<32x128xf32>
    %29 = arith.addf %26, %28 : vector<32x128xf32>
    %cst_25 = arith.constant 0.000000e+00 : f32
    %30 = vector.broadcast %cst_25 : f32 to vector<32x128xf32>
    %31 = arith.maximumf %29, %30 : vector<32x128xf32>
    %32 = vector.extract_strided_slice %31 {offsets = [0, 0], sizes = [16, 128], strides = [1, 1]} : vector<32x128xf32> to vector<16x128xf32>
    %c0_26 = arith.constant 0 : index
    %c0_27 = arith.constant 0 : index
    %c0_28 = arith.constant 0 : index
    %33 = vector.load %arg6[%c0_26, %c0_27, %c0_28] : memref<3x128x128xf32, #tpu.memory_space<vmem>>, vector<1x128x128xf32>
    %34 = vector.shape_cast %33 : vector<1x128x128xf32> to vector<128x128xf32>
    %cst_29 = arith.constant dense<0.000000e+00> : vector<16x128xf32>
    %35 = tpu.matmul %32, %34, %cst_29 {dimension_numbers = #tpu.dot_dimension_numbers<[1], [0], [0], [1], [0, 0, 1, 1], [], []>} : vector<16x128xf32>, vector<128x128xf32>, vector<16x128xf32> -> vector<16x128xf32>
    %36 = vector.extract_strided_slice %31 {offsets = [8, 0], sizes = [16, 128], strides = [1, 1]} : vector<32x128xf32> to vector<16x128xf32>
    %c1_30 = arith.constant 1 : index
    %c0_31 = arith.constant 0 : index
    %c0_32 = arith.constant 0 : index
    %37 = vector.load %arg6[%c1_30, %c0_31, %c0_32] : memref<3x128x128xf32, #tpu.memory_space<vmem>>, vector<1x128x128xf32>
    %38 = vector.shape_cast %37 : vector<1x128x128xf32> to vector<128x128xf32>
    %cst_33 = arith.constant dense<0.000000e+00> : vector<16x128xf32>
    %39 = tpu.matmul %36, %38, %cst_33 {dimension_numbers = #tpu.dot_dimension_numbers<[1], [0], [0], [1], [0, 0, 1, 1], [], []>} : vector<16x128xf32>, vector<128x128xf32>, vector<16x128xf32> -> vector<16x128xf32>
    %40 = arith.addf %35, %39 : vector<16x128xf32>
    %41 = vector.extract_strided_slice %31 {offsets = [16, 0], sizes = [16, 128], strides = [1, 1]} : vector<32x128xf32> to vector<16x128xf32>
    %c2_34 = arith.constant 2 : index
    %c0_35 = arith.constant 0 : index
    %c0_36 = arith.constant 0 : index
    %42 = vector.load %arg6[%c2_34, %c0_35, %c0_36] : memref<3x128x128xf32, #tpu.memory_space<vmem>>, vector<1x128x128xf32>
    %43 = vector.shape_cast %42 : vector<1x128x128xf32> to vector<128x128xf32>
    %cst_37 = arith.constant dense<0.000000e+00> : vector<16x128xf32>
    %44 = tpu.matmul %41, %43, %cst_37 {dimension_numbers = #tpu.dot_dimension_numbers<[1], [0], [0], [1], [0, 0, 1, 1], [], []>} : vector<16x128xf32>, vector<128x128xf32>, vector<16x128xf32> -> vector<16x128xf32>
    %45 = arith.addf %40, %44 : vector<16x128xf32>
    %c0_38 = arith.constant 0 : index
    %c0_39 = arith.constant 0 : index
    %46 = vector.load %arg7[%c0_38, %c0_39] : memref<1x128xf32, #tpu.memory_space<vmem>>, vector<1x128xf32>
    %47 = vector.broadcast %46 : vector<1x128xf32> to vector<16x128xf32>
    %48 = arith.addf %45, %47 : vector<16x128xf32>
    %cst_40 = arith.constant 0.000000e+00 : f32
    %49 = vector.broadcast %cst_40 : f32 to vector<16x128xf32>
    %50 = arith.maximumf %48, %49 : vector<16x128xf32>
    %cst_41 = arith.constant 0.000000e+00 : f32
    %51 = vector.broadcast %cst_41 : f32 to vector<16x128xf32>
    %c0_42 = arith.constant 0 : index
    %c0_43 = arith.constant 0 : index
    %52 = vector.load %arg18[%c0_42, %c0_43] : memref<48x128xf32, #tpu.memory_space<vmem>>, vector<16x128xf32>
    tpu.vector_store %arg18[%c0_42, %c0_43], %51 {strides = array<i32>} : memref<48x128xf32, #tpu.memory_space<vmem>>, vector<16x128xf32>,
    %c16 = arith.constant 16 : index
    %c0_44 = arith.constant 0 : index
    %53 = vector.load %arg18[%c16, %c0_44] : memref<48x128xf32, #tpu.memory_space<vmem>>, vector<16x128xf32>
    tpu.vector_store %arg18[%c16, %c0_44], %50 {strides = array<i32>} : memref<48x128xf32, #tpu.memory_space<vmem>>, vector<16x128xf32>,
    %cst_45 = arith.constant 0.000000e+00 : f32
    %54 = vector.broadcast %cst_45 : f32 to vector<16x128xf32>
    %c32 = arith.constant 32 : index
    %c0_46 = arith.constant 0 : index
    %55 = vector.load %arg18[%c32, %c0_46] : memref<48x128xf32, #tpu.memory_space<vmem>>, vector<16x128xf32>
    tpu.vector_store %arg18[%c32, %c0_46], %54 {strides = array<i32>} : memref<48x128xf32, #tpu.memory_space<vmem>>, vector<16x128xf32>,
    %c16_47 = arith.constant 16 : index
    %c0_48 = arith.constant 0 : index
    %56 = vector.load %arg18[%c16_47, %c0_48] : memref<48x128xf32, #tpu.memory_space<vmem>>, vector<32x128xf32>
    %c0_49 = arith.constant 0 : index
    %c0_50 = arith.constant 0 : index
    %c0_51 = arith.constant 0 : index
    %57 = vector.load %arg8[%c0_49, %c0_50, %c0_51] : memref<3x128x128xf32, #tpu.memory_space<vmem>>, vector<1x128x128xf32>
    %58 = vector.shape_cast %57 : vector<1x128x128xf32> to vector<128x128xf32>
    %cst_52 = arith.constant dense<0.000000e+00> : vector<32x128xf32>
    %59 = tpu.matmul %56, %58, %cst_52 {dimension_numbers = #tpu.dot_dimension_numbers<[1], [0], [0], [1], [0, 0, 1, 1], [], []>} : vector<32x128xf32>, vector<128x128xf32>, vector<32x128xf32> -> vector<32x128xf32>
    %c8_53 = arith.constant 8 : index
    %c0_54 = arith.constant 0 : index
    %60 = vector.load %arg18[%c8_53, %c0_54] : memref<48x128xf32, #tpu.memory_space<vmem>>, vector<32x128xf32>
    %c1_55 = arith.constant 1 : index
    %c0_56 = arith.constant 0 : index
    %c0_57 = arith.constant 0 : index
    %61 = vector.load %arg8[%c1_55, %c0_56, %c0_57] : memref<3x128x128xf32, #tpu.memory_space<vmem>>, vector<1x128x128xf32>
    %62 = vector.shape_cast %61 : vector<1x128x128xf32> to vector<128x128xf32>
    %cst_58 = arith.constant dense<0.000000e+00> : vector<32x128xf32>
    %63 = tpu.matmul %60, %62, %cst_58 {dimension_numbers = #tpu.dot_dimension_numbers<[1], [0], [0], [1], [0, 0, 1, 1], [], []>} : vector<32x128xf32>, vector<128x128xf32>, vector<32x128xf32> -> vector<32x128xf32>
    %64 = arith.addf %59, %63 : vector<32x128xf32>
    %c0_59 = arith.constant 0 : index
    %c0_60 = arith.constant 0 : index
    %65 = vector.load %arg18[%c0_59, %c0_60] : memref<48x128xf32, #tpu.memory_space<vmem>>, vector<32x128xf32>
    %c2_61 = arith.constant 2 : index
    %c0_62 = arith.constant 0 : index
    %c0_63 = arith.constant 0 : index
    %66 = vector.load %arg8[%c2_61, %c0_62, %c0_63] : memref<3x128x128xf32, #tpu.memory_space<vmem>>, vector<1x128x128xf32>
    %67 = vector.shape_cast %66 : vector<1x128x128xf32> to vector<128x128xf32>
    %cst_64 = arith.constant dense<0.000000e+00> : vector<32x128xf32>
    %68 = tpu.matmul %65, %67, %cst_64 {dimension_numbers = #tpu.dot_dimension_numbers<[1], [0], [0], [1], [0, 0, 1, 1], [], []>} : vector<32x128xf32>, vector<128x128xf32>, vector<32x128xf32> -> vector<32x128xf32>
    %69 = arith.addf %64, %68 : vector<32x128xf32>
    %c0_65 = arith.constant 0 : index
    %c0_66 = arith.constant 0 : index
    %70 = vector.load %arg9[%c0_65, %c0_66] : memref<1x128xf32, #tpu.memory_space<vmem>>, vector<1x128xf32>
    %71 = vector.broadcast %70 : vector<1x128xf32> to vector<32x128xf32>
    %72 = arith.addf %69, %71 : vector<32x128xf32>
    %cst_67 = arith.constant 0.000000e+00 : f32
    %73 = vector.broadcast %cst_67 : f32 to vector<32x128xf32>
    %74 = arith.maximumf %72, %73 : vector<32x128xf32>
    %75 = vector.extract_strided_slice %74 {offsets = [8, 0], sizes = [24, 128], strides = [1, 1]} : vector<32x128xf32> to vector<24x128xf32>
    %c0_68 = arith.constant 0 : index
    %c0_69 = arith.constant 0 : index
    %76 = vector.load %arg19[%c0_68, %c0_69] : memref<32x128xf32, #tpu.memory_space<vmem>>, vector<24x128xf32>
    tpu.vector_store %arg19[%c0_68, %c0_69], %75 {strides = array<i32>} : memref<32x128xf32, #tpu.memory_space<vmem>>, vector<24x128xf32>,
    %cst_70 = arith.constant 0.000000e+00 : f32
    %77 = vector.broadcast %cst_70 : f32 to vector<8x128xf32>
    %c24 = arith.constant 24 : index
    %c0_71 = arith.constant 0 : index
    %78 = vector.load %arg19[%c24, %c0_71] : memref<32x128xf32, #tpu.memory_space<vmem>>, vector<8x128xf32>
    tpu.vector_store %arg19[%c24, %c0_71], %77 {strides = array<i32>} : memref<32x128xf32, #tpu.memory_space<vmem>>, vector<8x128xf32>,
    %c1_72 = arith.constant 1 : index
    %c0_73 = arith.constant 0 : index
    %c0_74 = arith.constant 0 : index
    %79 = vector.load %arg10[%c1_72, %c0_73, %c0_74] : memref<3x128x256xf32, #tpu.memory_space<vmem>>, vector<1x128x256xf32>
    %80 = vector.shape_cast %79 : vector<1x128x256xf32> to vector<128x256xf32>
    %cst_75 = arith.constant dense<0.000000e+00> : vector<32x256xf32>
    %81 = tpu.matmul %74, %80, %cst_75 {dimension_numbers = #tpu.dot_dimension_numbers<[1], [0], [0], [1], [0, 0, 1, 1], [], []>} : vector<32x128xf32>, vector<128x256xf32>, vector<32x256xf32> -> vector<32x256xf32>
    %c0_76 = arith.constant 0 : index
    %c0_77 = arith.constant 0 : index
    %82 = vector.load %arg11[%c0_76, %c0_77] : memref<1x256xf32, #tpu.memory_space<vmem>>, vector<1x256xf32>
    %83 = vector.broadcast %82 : vector<1x256xf32> to vector<32x256xf32>
    %84 = arith.addf %81, %83 : vector<32x256xf32>
    %cst_78 = arith.constant 0.000000e+00 : f32
    %85 = vector.broadcast %cst_78 : f32 to vector<32x256xf32>
    %86 = arith.maximumf %84, %85 : vector<32x256xf32>
    %c2_79 = arith.constant 2 : index
    %c0_80 = arith.constant 0 : index
    %c0_81 = arith.constant 0 : index
    %87 = vector.load %arg10[%c2_79, %c0_80, %c0_81] : memref<3x128x256xf32, #tpu.memory_space<vmem>>, vector<1x128x256xf32>
    %88 = vector.shape_cast %87 : vector<1x128x256xf32> to vector<128x256xf32>
    %cst_82 = arith.constant dense<0.000000e+00> : vector<32x256xf32>
    %89 = tpu.matmul %74, %88, %cst_82 {dimension_numbers = #tpu.dot_dimension_numbers<[1], [0], [0], [1], [0, 0, 1, 1], [], []>} : vector<32x128xf32>, vector<128x256xf32>, vector<32x256xf32> -> vector<32x256xf32>
    %c0_83 = arith.constant 0 : index
    %c0_84 = arith.constant 0 : index
    %90 = vector.load %arg19[%c0_83, %c0_84] : memref<32x128xf32, #tpu.memory_space<vmem>>, vector<32x128xf32>
    %c0_85 = arith.constant 0 : index
    %c0_86 = arith.constant 0 : index
    %c0_87 = arith.constant 0 : index
    %91 = vector.load %arg10[%c0_85, %c0_86, %c0_87] : memref<3x128x256xf32, #tpu.memory_space<vmem>>, vector<1x128x256xf32>
    %92 = vector.shape_cast %91 : vector<1x128x256xf32> to vector<128x256xf32>
    %cst_88 = arith.constant dense<0.000000e+00> : vector<32x256xf32>
    %93 = tpu.matmul %90, %92, %cst_88 {dimension_numbers = #tpu.dot_dimension_numbers<[1], [0], [0], [1], [0, 0, 1, 1], [], []>} : vector<32x128xf32>, vector<128x256xf32>, vector<32x256xf32> -> vector<32x256xf32>
    %94 = arith.addf %89, %93 : vector<32x256xf32>
    %c0_89 = arith.constant 0 : index
    %c0_90 = arith.constant 0 : index
    %95 = vector.load %arg11[%c0_89, %c0_90] : memref<1x256xf32, #tpu.memory_space<vmem>>, vector<1x256xf32>
    %96 = vector.broadcast %95 : vector<1x256xf32> to vector<32x256xf32>
    %97 = arith.addf %94, %96 : vector<32x256xf32>
    %cst_91 = arith.constant 0.000000e+00 : f32
    %98 = vector.broadcast %cst_91 : f32 to vector<32x256xf32>
    %99 = arith.maximumf %97, %98 : vector<32x256xf32>
    %100 = vector.extract_strided_slice %86 {offsets = [8, 0], sizes = [24, 256], strides = [1, 1]} : vector<32x256xf32> to vector<24x256xf32>
    %c0_92 = arith.constant 0 : index
    %c0_93 = arith.constant 0 : index
    %101 = vector.load %arg20[%c0_92, %c0_93] : memref<32x256xf32, #tpu.memory_space<vmem>>, vector<24x256xf32>
    tpu.vector_store %arg20[%c0_92, %c0_93], %100 {strides = array<i32>} : memref<32x256xf32, #tpu.memory_space<vmem>>, vector<24x256xf32>,
    %cst_94 = arith.constant 0.000000e+00 : f32
    %102 = vector.broadcast %cst_94 : f32 to vector<8x256xf32>
    %c24_95 = arith.constant 24 : index
    %c0_96 = arith.constant 0 : index
    %103 = vector.load %arg20[%c24_95, %c0_96] : memref<32x256xf32, #tpu.memory_space<vmem>>, vector<8x256xf32>
    tpu.vector_store %arg20[%c24_95, %c0_96], %102 {strides = array<i32>} : memref<32x256xf32, #tpu.memory_space<vmem>>, vector<8x256xf32>,
    %c0_97 = arith.constant 0 : index
    %c0_98 = arith.constant 0 : index
    %104 = vector.load %arg12[%c0_97, %c0_98] : memref<256x128xf32, #tpu.memory_space<vmem>>, vector<256x128xf32>
    %cst_99 = arith.constant dense<0.000000e+00> : vector<32x128xf32>
    %105 = tpu.matmul %86, %104, %cst_99 {dimension_numbers = #tpu.dot_dimension_numbers<[1], [0], [0], [1], [0, 0, 1, 1], [], []>} : vector<32x256xf32>, vector<256x128xf32>, vector<32x128xf32> -> vector<32x128xf32>
    %c0_100 = arith.constant 0 : index
    %c0_101 = arith.constant 0 : index
    %106 = vector.load %arg13[%c0_100, %c0_101] : memref<256x128xf32, #tpu.memory_space<vmem>>, vector<256x128xf32>
    %cst_102 = arith.constant dense<0.000000e+00> : vector<32x128xf32>
    %107 = tpu.matmul %99, %106, %cst_102 {dimension_numbers = #tpu.dot_dimension_numbers<[1], [0], [0], [1], [0, 0, 1, 1], [], []>} : vector<32x256xf32>, vector<256x128xf32>, vector<32x128xf32> -> vector<32x128xf32>
    %108 = arith.addf %105, %107 : vector<32x128xf32>
    %c0_103 = arith.constant 0 : index
    %c0_104 = arith.constant 0 : index
    %109 = vector.load %arg20[%c0_103, %c0_104] : memref<32x256xf32, #tpu.memory_space<vmem>>, vector<32x256xf32>
    %c0_105 = arith.constant 0 : index
    %c0_106 = arith.constant 0 : index
    %110 = vector.load %arg14[%c0_105, %c0_106] : memref<256x128xf32, #tpu.memory_space<vmem>>, vector<256x128xf32>
    %cst_107 = arith.constant dense<0.000000e+00> : vector<32x128xf32>
    %111 = tpu.matmul %109, %110, %cst_107 {dimension_numbers = #tpu.dot_dimension_numbers<[1], [0], [0], [1], [0, 0, 1, 1], [], []>} : vector<32x256xf32>, vector<256x128xf32>, vector<32x128xf32> -> vector<32x128xf32>
    %112 = arith.addf %108, %111 : vector<32x128xf32>
    %c0_108 = arith.constant 0 : index
    %c0_109 = arith.constant 0 : index
    %113 = vector.load %arg15[%c0_108, %c0_109] : memref<1x128xf32, #tpu.memory_space<vmem>>, vector<1x128xf32>
    %114 = vector.broadcast %113 : vector<1x128xf32> to vector<32x128xf32>
    %115 = arith.addf %112, %114 : vector<32x128xf32>
    %116 = arith.negf %115 : vector<32x128xf32>
    %117 = math.exp %116 : vector<32x128xf32>
    %cst_110 = arith.constant 1.000000e+00 : f32
    %118 = vector.broadcast %cst_110 : f32 to vector<32x128xf32>
    %119 = arith.addf %118, %117 : vector<32x128xf32>
    %120 = arith.divf %118, %119 : vector<32x128xf32>
    %c0_111 = arith.constant 0 : index
    %c0_112 = arith.constant 0 : index
    %c0_113 = arith.constant 0 : index
    %121 = vector.load %arg16[%c0_111, %c0_112, %c0_113] : memref<1x32x128xf32, #tpu.memory_space<vmem>>, vector<1x32x128xf32>
    %122 = vector.shape_cast %121 : vector<1x32x128xf32> to vector<32x128xf32>
    %123 = vector.shape_cast %120 : vector<32x128xf32> to vector<1x32x128xf32>
    tpu.vector_store %arg16[%c0_111, %c0_112, %c0_113], %123 {strides = array<i32>} : memref<1x32x128xf32, #tpu.memory_space<vmem>>, vector<1x32x128xf32>,
    return
  }
  func.func @transform_0(%arg0: i32) -> (i32, i32, i32) {
    %c0_i32 = arith.constant 0 : i32
    %c0_i32_0 = arith.constant 0 : i32
    %c0_i32_1 = arith.constant 0 : i32
    return %arg0, %c0_i32, %c0_i32_0 : i32, i32, i32
  }
  func.func @transform_1(%arg0: i32) -> (i32, i32) {
    %c0_i32 = arith.constant 0 : i32
    %c0_i32_0 = arith.constant 0 : i32
    %c0_i32_1 = arith.constant 0 : i32
    return %c0_i32, %c0_i32_0 : i32, i32
  }
  func.func @transform_2(%arg0: i32) -> (i32, i32) {
    %c0_i32 = arith.constant 0 : i32
    %c0_i32_0 = arith.constant 0 : i32
    %c0_i32_1 = arith.constant 0 : i32
    return %c0_i32, %c0_i32_0 : i32, i32
  }
  func.func @transform_3(%arg0: i32) -> (i32, i32, i32) {
    %c0_i32 = arith.constant 0 : i32
    %c0_i32_0 = arith.constant 0 : i32
    %c0_i32_1 = arith.constant 0 : i32
    %c0_i32_2 = arith.constant 0 : i32
    return %c0_i32, %c0_i32_0, %c0_i32_1 : i32, i32, i32
  }
  func.func @transform_4(%arg0: i32) -> (i32, i32) {
    %c0_i32 = arith.constant 0 : i32
    %c0_i32_0 = arith.constant 0 : i32
    %c0_i32_1 = arith.constant 0 : i32
    return %c0_i32, %c0_i32_0 : i32, i32
  }
  func.func @transform_5(%arg0: i32) -> (i32, i32, i32) {
    %c0_i32 = arith.constant 0 : i32
    %c0_i32_0 = arith.constant 0 : i32
    %c0_i32_1 = arith.constant 0 : i32
    %c0_i32_2 = arith.constant 0 : i32
    return %c0_i32, %c0_i32_0, %c0_i32_1 : i32, i32, i32
  }
  func.func @transform_6(%arg0: i32) -> (i32, i32) {
    %c0_i32 = arith.constant 0 : i32
    %c0_i32_0 = arith.constant 0 : i32
    %c0_i32_1 = arith.constant 0 : i32
    return %c0_i32, %c0_i32_0 : i32, i32
  }
  func.func @transform_7(%arg0: i32) -> (i32, i32, i32) {
    %c0_i32 = arith.constant 0 : i32
    %c0_i32_0 = arith.constant 0 : i32
    %c0_i32_1 = arith.constant 0 : i32
    %c0_i32_2 = arith.constant 0 : i32
    return %c0_i32, %c0_i32_0, %c0_i32_1 : i32, i32, i32
  }
  func.func @transform_8(%arg0: i32) -> (i32, i32) {
    %c0_i32 = arith.constant 0 : i32
    %c0_i32_0 = arith.constant 0 : i32
    %c0_i32_1 = arith.constant 0 : i32
    return %c0_i32, %c0_i32_0 : i32, i32
  }
  func.func @transform_9(%arg0: i32) -> (i32, i32, i32) {
    %c0_i32 = arith.constant 0 : i32
    %c0_i32_0 = arith.constant 0 : i32
    %c0_i32_1 = arith.constant 0 : i32
    %c0_i32_2 = arith.constant 0 : i32
    return %c0_i32, %c0_i32_0, %c0_i32_1 : i32, i32, i32
  }
  func.func @transform_10(%arg0: i32) -> (i32, i32) {
    %c0_i32 = arith.constant 0 : i32
    %c0_i32_0 = arith.constant 0 : i32
    %c0_i32_1 = arith.constant 0 : i32
    return %c0_i32, %c0_i32_0 : i32, i32
  }
  func.func @transform_11(%arg0: i32) -> (i32, i32) {
    %c0_i32 = arith.constant 0 : i32
    %c0_i32_0 = arith.constant 0 : i32
    %c0_i32_1 = arith.constant 0 : i32
    return %c0_i32, %c0_i32_0 : i32, i32
  }
  func.func @transform_12(%arg0: i32) -> (i32, i32) {
    %c0_i32 = arith.constant 0 : i32
    %c0_i32_0 = arith.constant 0 : i32
    %c0_i32_1 = arith.constant 0 : i32
    return %c0_i32, %c0_i32_0 : i32, i32
  }
  func.func @transform_13(%arg0: i32) -> (i32, i32) {
    %c0_i32 = arith.constant 0 : i32
    %c0_i32_0 = arith.constant 0 : i32
    %c0_i32_1 = arith.constant 0 : i32
    return %c0_i32, %c0_i32_0 : i32, i32
  }
  func.func @transform_14(%arg0: i32) -> (i32, i32) {
    %c0_i32 = arith.constant 0 : i32
    %c0_i32_0 = arith.constant 0 : i32
    %c0_i32_1 = arith.constant 0 : i32
    return %c0_i32, %c0_i32_0 : i32, i32
  }
  func.func @transform_15(%arg0: i32) -> (i32, i32, i32) {
    %c0_i32 = arith.constant 0 : i32
    %c0_i32_0 = arith.constant 0 : i32
    %c0_i32_1 = arith.constant 0 : i32
    return %arg0, %c0_i32, %c0_i32_0 : i32, i32, i32
  }
}

</mosaic_0001>

<bundles_post_ra>
// kernel: forward_pallas.1
= control target key start
LH: loop header
LB: loop body
LE: loop exit
PB: predicated region body
PF: predicated region fallthrough
CT: control target
= control target key end

     0   :  { %20 = vsyncpa [#allocation7], 0  ;;  %s4281_s0 = inlined_call_operand.vmem [shape: f32[1,64,48], index: 0, kind: input, shape index: {}]   ;;  %s4282_s1 = inlined_call_operand.vmem [shape: f32[48,256], index: 1, kind: input, shape index: {}]   ;;  %s4283_s2 = inlined_call_operand.vmem [shape: f32[1,256], index: 2, kind: input, shape index: {}]   ;;  %s4284_s3 = inlined_call_operand.vmem [shape: f32[3,256,128], index: 3, kind: input, shape index: {}]   ;;  %s4285_s4 = inlined_call_operand.vmem [shape: f32[1,128], index: 4, kind: input, shape index: {}]   ;;  %s4286_s5 = inlined_call_operand.hbm [shape: f32[3,128,128], index: 5, kind: input, shape index: {}]   ;;  %s4287_s6 = inlined_call_operand.vmem [shape: f32[1,128], index: 6, kind: input, shape index: {}]   ;;  %s4288_s7 = inlined_call_operand.hbm [shape: f32[3,128,128], index: 7, kind: input, shape index: {}]   ;;  %s4289_s8 = inlined_call_operand.vmem [shape: f32[1,128], index: 8, kind: input, shape index: {}]   ;;  %s4290_s9 = inlined_call_operand.hbm [shape: f32[3,128,256], index: 9, kind: input, shape index: {}]   ;;  %s4291_s10 = inlined_call_operand.vmem [shape: f32[1,256], index: 10, kind: input, shape index: {}]   ;;  %s4292_s11 = inlined_call_operand.hbm [shape: f32[256,128], index: 11, kind: input, shape index: {}]   ;;  %s4293_s12 = inlined_call_operand.hbm [shape: f32[256,128], index: 12, kind: input, shape index: {}]   ;;  %s4294_s13 = inlined_call_operand.hbm [shape: f32[256,128], index: 13, kind: input, shape index: {}]   ;;  %s4295_s14 = inlined_call_operand.vmem [shape: f32[1,128], index: 14, kind: input, shape index: {}]   ;;  %s4296_s15 = inlined_call_operand.vmem [shape: f32[1,32,128], index: 15, kind: output, shape index: {}]  }
   0x1   :  { %21 = vsyncpa [#allocation9], 0 }
   0x2   :  { %22 = vsyncpa [#allocation12], 0 }
   0x3   :  { %23 = vsyncpa [#allocation15], 0  ;;  %s3519_s18 = smov [#allocation8]   ;;  %s3520_s20 = smov [#allocation11]  }
   0x4   :  { %s53_s19 = sshll.u32 %s3519_s18, 4  ;;  %s81_s21 = sshll.u32 %s3520_s20, 4  ;;  %s54_s19 = int_to_ptr.vmem [resolvable:$true] %s53_s19  ;;  %s3610_s21 = int_to_ptr.vmem [resolvable:$true] %s81_s21 }
   0x5   :  { %s3379_s24 = scalar_lea.hbm %s4288_s7, 6144 }
   0x6   :  { %p3380_p0 = scmp.ne.s32.totalorder %s4288_s7, %s3379_s24  ;;  %p3383_p1 = scmp.lt.u32.totalorder %s3379_s24, %s4288_s7 }
   0x8   :  { %p3385_p2 = pnand %p3383_p1, %p3380_p0 }
   0xa   :  { %3388 = shalt.err (!%p3385_p2)
}
   0xb   :  { %s3389_s29 = scalar_lea.vmem %s54_s19, 6144  ;;  %p3394_p4 = scmp.lt.s32.totalorder %s54_s19, %s54_s19 }
   0xc   :  { %p3390_p3 = scmp.ne.s32.totalorder %s54_s19, %s3389_s29  ;;  %p3395_p5 = scmp.lt.s32.totalorder %s3389_s29, %s3389_s29 }
   0xe   :  { %p3396_p6 = por %p3395_p5, %p3394_p4 }
  0x10   :  { %p3397_p7 = pnand %p3396_p6, %p3390_p3 }
  0x12   :  { %3400 = shalt.err (!%p3397_p7)
}
  0x13   :  { %s3521_s30 = smov 128   ;;  %s3522_s16 = smov 8  }
  0x14   :  { %59 = dma.hbm_to_vmem [thread:$0]  %s4288_s7, 6144, %s54_s19, [#allocation9], %s3521_s30, %s3521_s30, %s3522_s16  }
  0x15   :  { %s3401_s23 = scalar_lea.hbm %s4292_s11, 4096 }
  0x16   :  { %p3402_p8 = scmp.ne.s32.totalorder %s4292_s11, %s3401_s23  ;;  %p3405_p9 = scmp.lt.u32.totalorder %s3401_s23, %s4292_s11 }
  0x18   :  { %p3407_p10 = pnand %p3405_p9, %p3402_p8 }
  0x1a   :  { %3410 = shalt.err (!%p3407_p10)
}
  0x1b   :  { %s3411_s28 = scalar_lea.vmem %s3610_s21, 4096  ;;  %p3416_p12 = scmp.lt.s32.totalorder %s3610_s21, %s3610_s21 }
  0x1c   :  { %p3412_p11 = scmp.ne.s32.totalorder %s3610_s21, %s3411_s28  ;;  %p3417_p13 = scmp.lt.s32.totalorder %s3411_s28, %s3411_s28 }
  0x1e   :  { %p3418_p0 = por %p3417_p13, %p3416_p12 }
  0x20   :  { %p3419_p1 = pnand %p3418_p0, %p3412_p11 }
  0x22   :  { %3422 = shalt.err (!%p3419_p1)
}
  0x23   :  { %87 = dma.hbm_to_vmem [thread:$0]  %s4292_s11, 4096, %s3610_s21, [#allocation12], %s3521_s30, %s3521_s30, %s3522_s16  }
  0x24   :  { %s3523_s29 = smov [#allocation6]   ;;  %s3524_s18 = smov [#allocation10]  }
  0x25   :  { %s39_s17 = sshll.u32 %s3523_s29, 4  ;;  %s67_s20 = sshll.u32 %s3524_s18, 4  ;;  %s40_s17 = int_to_ptr.vmem [resolvable:$true] %s39_s17  ;;  %s3647_s20 = int_to_ptr.vmem [resolvable:$true] %s67_s20 }
  0x26   :  { %s3423_s24 = scalar_lea.hbm %s4286_s5, 6144 }
  0x27   :  { %p3424_p2 = scmp.ne.s32.totalorder %s4286_s5, %s3423_s24  ;;  %p3427_p3 = scmp.lt.u32.totalorder %s3423_s24, %s4286_s5 }
  0x29   :  { %p3429_p4 = pnand %p3427_p3, %p3424_p2 }
  0x2b   :  { %3432 = shalt.err (!%p3429_p4)
}
  0x2c   :  { %s3433_s11 = scalar_lea.vmem %s40_s17, 6144  ;;  %p3438_p6 = scmp.lt.s32.totalorder %s40_s17, %s40_s17 }
  0x2d   :  { %p3434_p5 = scmp.ne.s32.totalorder %s40_s17, %s3433_s11  ;;  %p3439_p7 = scmp.lt.s32.totalorder %s3433_s11, %s3433_s11 }
  0x2f   :  { %p3440_p8 = por %p3439_p7, %p3438_p6 }
  0x31   :  { %p3441_p9 = pnand %p3440_p8, %p3434_p5 }
  0x33   :  { %3444 = shalt.err (!%p3441_p9)
}
  0x34   :  { %45 = dma.hbm_to_vmem [thread:$0]  %s4286_s5, 6144, %s40_s17, [#allocation7], %s3521_s30, %s3521_s30, %s3522_s16  }
  0x35   :  { %s3445_s18 = scalar_lea.hbm %s4290_s9, 12288 }
  0x36   :  { %p3446_p10 = scmp.ne.s32.totalorder %s4290_s9, %s3445_s18  ;;  %p3449_p11 = scmp.lt.u32.totalorder %s3445_s18, %s4290_s9 }
  0x38   :  { %p3451_p12 = pnand %p3449_p11, %p3446_p10 }
  0x3a   :  { %3454 = shalt.err (!%p3451_p12)
}
  0x3b   :  { %s3455_s26 = scalar_lea.vmem %s3647_s20, 12288  ;;  %p3460_p0 = scmp.lt.s32.totalorder %s3647_s20, %s3647_s20 }
  0x3c   :  { %p3456_p13 = scmp.ne.s32.totalorder %s3647_s20, %s3455_s26  ;;  %p3461_p1 = scmp.lt.s32.totalorder %s3455_s26, %s3455_s26 }
  0x3e   :  { %p3462_p2 = por %p3461_p1, %p3460_p0 }
  0x40   :  { %p3463_p3 = pnand %p3462_p2, %p3456_p13 }
  0x42   :  { %3466 = shalt.err (!%p3463_p3)
}
  0x43   :  { %s3525_s5 = smov 256   ;;  %s3526_s17 = smov 16  }
  0x44   :  { %73 = dma.hbm_to_vmem [thread:$0]  %s4290_s9, 12288, %s3647_s20, [#allocation9], %s3525_s5, %s3525_s5, %s3526_s17  }
  0x45   :  { %s3527_s11 = smov [#allocation13]   ;;  %s3528_s7 = smov [#allocation14]  }
  0x46   :  { %s93_s21 = sshll.u32 %s3527_s11, 4  ;;  %s105_s19 = sshll.u32 %s3528_s7, 4  ;;  %s94_s21 = int_to_ptr.vmem [resolvable:$true] %s93_s21  ;;  %s3681_s19 = int_to_ptr.vmem [resolvable:$true] %s105_s19 }
  0x47   :  { %s3467_s22 = scalar_lea.hbm %s4293_s12, 4096 }
  0x48   :  { %p3468_p4 = scmp.ne.s32.totalorder %s4293_s12, %s3467_s22  ;;  %p3471_p5 = scmp.lt.u32.totalorder %s3467_s22, %s4293_s12 }
  0x4a   :  { %p3473_p6 = pnand %p3471_p5, %p3468_p4 }
  0x4c   :  { %3476 = shalt.err (!%p3473_p6)
}
  0x4d   :  { %s3477_s9 = scalar_lea.vmem %s94_s21, 4096  ;;  %p3482_p8 = scmp.lt.s32.totalorder %s94_s21, %s94_s21 }
  0x4e   :  { %p3478_p7 = scmp.ne.s32.totalorder %s94_s21, %s3477_s9  ;;  %p3483_p9 = scmp.lt.s32.totalorder %s3477_s9, %s3477_s9 }
  0x50   :  { %p3484_p10 = por %p3483_p9, %p3482_p8 }
  0x52   :  { %p3485_p11 = pnand %p3484_p10, %p3478_p7 }
  0x54   :  { %3488 = shalt.err (!%p3485_p11)
}
  0x55   :  { %99 = dma.hbm_to_vmem [thread:$0]  %s4293_s12, 4096, %s94_s21, [#allocation12], %s3521_s30, %s3521_s30, %s3522_s16  }
  0x56   :  { %s3489_s28 = scalar_lea.hbm %s4294_s13, 4096 }
  0x57   :  { %p3490_p12 = scmp.ne.s32.totalorder %s4294_s13, %s3489_s28  ;;  %p3493_p13 = scmp.lt.u32.totalorder %s3489_s28, %s4294_s13 }
  0x59   :  { %p3495_p0 = pnand %p3493_p13, %p3490_p12 }
  0x5b   :  { %3498 = shalt.err (!%p3495_p0)
}
  0x5c   :  { %s3499_s22 = scalar_lea.vmem %s3681_s19, 4096  ;;  %p3504_p2 = scmp.lt.s32.totalorder %s3681_s19, %s3681_s19 }
  0x5d   :  { %p3500_p1 = scmp.ne.s32.totalorder %s3681_s19, %s3499_s22  ;;  %p3505_p3 = scmp.lt.s32.totalorder %s3499_s22, %s3499_s22 }
  0x5f   :  { %p3506_p4 = por %p3505_p3, %p3504_p2 }
  0x61   :  { %p3507_p5 = pnand %p3506_p4, %p3500_p1 }
  0x63   :  { %3510 = shalt.err (!%p3507_p5)
}
  0x64   :  { %111 = dma.hbm_to_vmem [thread:$0]  %s4294_s13, 4096, %s3681_s19, [#allocation15], %s3521_s30, %s3521_s30, %s3522_s16  }
  0x65   :  { %3511 = dma.done.wait [#allocation7], 6144  }
  0x66   :  { %3512 = vsyncadd [#allocation7], 4294961152 }
  0x67   :  { %3513 = dma.done.wait [#allocation9], 18432  }
  0x68   :  { %3514 = vsyncadd [#allocation9], 4294948864 }
  0x69   :  { %3515 = dma.done.wait [#allocation12], 8192  }
  0x6a   :  { %3516 = vsyncadd [#allocation12], 4294959104 }
  0x6b   :  { %3517 = dma.done.wait [#allocation15], 4096  }
  0x6c   :  { %3518 = vsyncadd [#allocation15], 4294963200  ;;  %v3529_v0 = vmov 0.0   ;;  %v141_v1 = vld [vmem:[%s4282_s1 + $0x8] sm:$0xff]  ;;  %v143_v2 = vld [vmem:[%s4282_s1 + $0x18] sm:$0xff]  ;;  %vm164_vm0 = vcmask 392192  }
  0x6d   :  { %253 = vmatprep.mubr.f32.mxu0 %v3529_v0  ;;  %v140_v3 = vld [vmem:[%s4282_s1] sm:$0xff]  ;;  %v2840_v4 = vpack.c.bf16 %v143_v2, %v141_v1  ;;  %v142_v5 = vld [vmem:[%s4282_s1 + $0x10] sm:$0xff]  ;;  %v145_v6 = vld [vmem:[%s4282_s1 + $0x28] sm:$0xff] }
  0x6e   :  { %v147_v7 = vld [vmem:[%s4282_s1 + $0x38] sm:$0xff]  ;;  %v2842_v8 = vpack.c.bf16 %v142_v5, %v140_v3  ;;  %v144_v10 = vld [vmem:[%s4282_s1 + $0x20] sm:$0xff]  ;;  %v146_v11 = vld [vmem:[%s4282_s1 + $0x30] sm:$0xff] }
  0x6f   :  { %v2844_v9 = vpack.c.bf16 %v147_v7, %v145_v6  ;;  %v149_v12 = vld [vmem:[%s4282_s1 + $0x48] sm:$0xff]  ;;  %2841 = vmatprep.subr.bf16.mxu0 %v2840_v4  ;;  %v151_v13 = vld [vmem:[%s4282_s1 + $0x58] sm:$0xff]  ;;  %v2846_v14 = vpack.c.bf16 %v146_v11, %v144_v10  ;;  %v148_v16 = vld [vmem:[%s4282_s1 + $0x40] sm:$0xff] }
  0x70   :  { %2843 = vmatpush1.bf16.msra.mxu0 %v2842_v8  ;;  %v2848_v15 = vpack.c.bf16 %v151_v13, %v149_v12  ;;  %v150_v17 = vld [vmem:[%s4282_s1 + $0x50] sm:$0xff]  ;;  %v2187_v18 = vld [vmem:[%s4284_s3 + $0x180] sm:$0xff]  ;;  %v2188_v19 = vld [vmem:[%s4284_s3 + $0x188] sm:$0xff] }
  0x71   :  { %2845 = vmatprep.subr.bf16.mxu0 %v2844_v9  ;;  %v2171_v20 = vld [vmem:[%s4284_s3 + $0x100] sm:$0xff]  ;;  %v2172_v21 = vld [vmem:[%s4284_s3 + $0x108] sm:$0xff]  ;;  %v2850_v22 = vpack.c.bf16 %v150_v17, %v148_v16  ;;  %v2852_v23 = vpack.c.bf16 %v2188_v19, %v2187_v18  ;;  %v2189_v30 = vld [vmem:[%s4284_s3 + $0x190] sm:$0xff] }
  0x72   :  { %v2854_v24 = vpack.c.bf16 %v2172_v21, %v2171_v20  ;;  %v350_v25 = vld [vmem:[%s4284_s3 + $0x80] sm:$0xff]  ;;  %v351_v26 = vld [vmem:[%s4284_s3 + $0x88] sm:$0xff]  ;;  %v2190_v31 = vld [vmem:[%s4284_s3 + $0x198] sm:$0xff] }
  0x73   :  { %v334_v27 = vld [vmem:[%s4284_s3] sm:$0xff]  ;;  %v2884_v28 = vpack.c.bf16 %v351_v26, %v350_v25  ;;  %v335_v29 = vld [vmem:[%s4284_s3 + $0x8] sm:$0xff]  ;;  %2853 = vmatprep.subr.bf16.mxu1 %v2852_v23  ;;  %v2856_v32 = vpack.c.bf16 %v2190_v31, %v2189_v30  ;;  %v2173_v33 = vld [vmem:[%s4284_s3 + $0x110] sm:$0xff] }
  0x74   :  { %2847 = vmatpush1.bf16.msra.mxu0 %v2846_v14  ;;  %v2174_v34 = vld [vmem:[%s4284_s3 + $0x118] sm:$0xff]  ;;  %v352_v35 = vld [vmem:[%s4284_s3 + $0x90] sm:$0xff]  ;;  %v132_v36 = vld [vmem:[%s4281_s0] sm:$0xff]  ;;  %2855 = vmatpush3.bf16.msra.mxu1 %v2854_v24  ;;  %v2886_v39 = vpack.c.bf16 %v335_v29, %v334_v27 }
  0x75   :  { %2849 = vmatprep.subr.bf16.mxu0 %v2848_v15  ;;  %v2858_v37 = vpack.c.bf16 %v2174_v34, %v2173_v33  ;;  %v353_v38 = vld [vmem:[%s4284_s3 + $0x98] sm:$0xff]  ;;  %2857 = vmatprep.subr.bf16.mxu1 %v2856_v32  ;;  %v2191_v40 = vld [vmem:[%s4284_s3 + $0x1a0] sm:$0xff]  ;;  %v2192_v41 = vld [vmem:[%s4284_s3 + $0x1a8] sm:$0xff] }
  0x76   :  { %v2175_v42 = vld [vmem:[%s4284_s3 + $0x120] sm:$0xff]  ;;  %v2888_v43 = vpack.c.bf16 %v353_v38, %v352_v35  ;;  %v336_v44 = vld [vmem:[%s4284_s3 + $0x10] sm:$0xff]  ;;  %v337_v45 = vld [vmem:[%s4284_s3 + $0x18] sm:$0xff]  ;;  %v2860_v46 = vpack.c.bf16 %v2192_v41, %v2191_v40 }
  0x77   :  { %v2176_v47 = vld [vmem:[%s4284_s3 + $0x128] sm:$0xff]  ;;  %v354_v48 = vld [vmem:[%s4284_s3 + $0xa0] sm:$0xff]  ;;  %v2193_v50 = vld [vmem:[%s4284_s3 + $0x1b0] sm:$0xff]  ;;  %v2890_v54 = vpack.c.bf16 %v337_v45, %v336_v44 }
  0x78   :  { %2851 = vmatpush1.bf16.msra.mxu0 %v2850_v22  ;;  %v355_v49 = vld [vmem:[%s4284_s3 + $0xa8] sm:$0xff]  ;;  %2859 = vmatpush3.bf16.msra.mxu1 %v2858_v37  ;;  %v2862_v51 = vpack.c.bf16 %v2176_v47, %v2175_v42  ;;  %v2194_v52 = vld [vmem:[%s4284_s3 + $0x1b8] sm:$0xff]  ;;  %v2177_v55 = vld [vmem:[%s4284_s3 + $0x130] sm:$0xff] }
  0x79   :  { %2885 = vmatprep.subr.bf16.mxu0 %v2884_v28  ;;  %v133_v53 = vld [vmem:[%s4281_s0 + $0x8] sm:$0xff]  ;;  %v2178_v56 = vld [vmem:[%s4284_s3 + $0x138] sm:$0xff]  ;;  %2861 = vmatprep.subr.bf16.mxu1 %v2860_v46  ;;  %v2892_v57 = vpack.c.bf16 %v355_v49, %v354_v48  ;;  %v338_v58 = vld [vmem:[%s4284_s3 + $0x20] sm:$0xff]  ;;  %v2864_v60 = vpack.c.bf16 %v2194_v52, %v2193_v50 }
  0x7a   :  { %v339_v59 = vld [vmem:[%s4284_s3 + $0x28] sm:$0xff]  ;;  %v356_v61 = vld [vmem:[%s4284_s3 + $0xb0] sm:$0xff]  ;;  %v357_v62 = vld [vmem:[%s4284_s3 + $0xb8] sm:$0xff]  ;;  %v2866_v2 = vpack.c.bf16 %v2178_v56, %v2177_v55 }
  0x7b   :  { %2163 = vmatmul.mubr.msk.f32.vlgmr.msra.gmra.mrb[0].mxu0 %vm164_vm0, %v132_v36  ;;  %v2195_v63 = vld [vmem:[%s4284_s3 + $0x1c0] sm:$0xff]  ;;  %v2196_v1 = vld [vmem:[%s4284_s3 + $0x1c8] sm:$0xff]  ;;  %v134_v3 = vld [vmem:[%s4281_s0 + $0x10] sm:$0xff]  ;;  %v2894_v4 = vpack.c.bf16 %v339_v59, %v338_v58  ;;  %v2896_v7 = vpack.c.bf16 %v357_v62, %v356_v61 }
  0x7c   :  { %259 = vmatprep.mubr.f32.mxu0 %v3529_v0  ;;  %2887 = vmatpush3.bf16.msra.mxu0 %v2886_v39  ;;  %v2179_v5 = vld [vmem:[%s4284_s3 + $0x140] sm:$0xff]  ;;  %v2180_v6 = vld [vmem:[%s4284_s3 + $0x148] sm:$0xff]  ;;  %v340_v8 = vld [vmem:[%s4284_s3 + $0x30] sm:$0xff]  ;;  %v2868_v10 = vpack.c.bf16 %v2196_v1, %v2195_v63  ;;  %v154_v63 = vlaneseq }
  0x7d   :  { %2889 = vmatprep.subr.bf16.mxu0 %v2888_v43  ;;  %2863 = vmatpush3.bf16.msra.mxu1 %v2862_v51  ;;  %v341_v9 = vld [vmem:[%s4284_s3 + $0x38] sm:$0xff]  ;;  %v358_v11 = vld [vmem:[%s4284_s3 + $0xc0] sm:$0xff]  ;;  %v359_v12 = vld [vmem:[%s4284_s3 + $0xc8] sm:$0xff]  ;;  %v2870_v15 = vpack.c.bf16 %v2180_v6, %v2179_v5 }
  0x7e   :  { %2865 = vmatprep.subr.bf16.mxu1 %v2864_v60  ;;  %v2197_v13 = vld [vmem:[%s4284_s3 + $0x1d0] sm:$0xff]  ;;  %v2198_v14 = vld [vmem:[%s4284_s3 + $0x1d8] sm:$0xff]  ;;  %v2898_v17 = vpack.c.bf16 %v341_v9, %v340_v8  ;;  %v2900_v20 = vpack.c.bf16 %v359_v12, %v358_v11  ;;  %v342_v21 = vld [vmem:[%s4284_s3 + $0x40] sm:$0xff]  ;;  %v3994_v1 = vshrl.u32 %v154_v63, 7 }
  0x7f   :  { %2164 = vmatmul.mubr.msk.f32.gmra.mrb[2].mxu0 %vm164_vm0, %v133_v53  ;;  %v135_v16 = vld [vmem:[%s4281_s0 + $0x18] sm:$0xff]  ;;  %v2181_v18 = vld [vmem:[%s4284_s3 + $0x150] sm:$0xff]  ;;  %v343_v22 = vld [vmem:[%s4284_s3 + $0x48] sm:$0xff]  ;;  %v2872_v23 = vpack.c.bf16 %v2198_v14, %v2197_v13 }
  0x80   :  { %265 = vmatprep.mubr.f32.mxu0 %v3529_v0  ;;  %2891 = vmatpush3.bf16.msra.mxu0 %v2890_v54  ;;  %v2182_v19 = vld [vmem:[%s4284_s3 + $0x158] sm:$0xff]  ;;  %v360_v24 = vld [vmem:[%s4284_s3 + $0xd0] sm:$0xff]  ;;  %v2199_v26 = vld [vmem:[%s4284_s3 + $0x1e0] sm:$0xff]  ;;  %v2902_v30 = vpack.c.bf16 %v343_v22, %v342_v21 }
  0x81   :  { %2893 = vmatprep.subr.bf16.mxu0 %v2892_v57  ;;  %2867 = vmatpush3.bf16.msra.mxu1 %v2866_v2  ;;  %v361_v25 = vld [vmem:[%s4284_s3 + $0xd8] sm:$0xff]  ;;  %v2200_v27 = vld [vmem:[%s4284_s3 + $0x1e8] sm:$0xff]  ;;  %v2874_v28 = vpack.c.bf16 %v2182_v19, %v2181_v18  ;;  %v136_v29 = vld [vmem:[%s4281_s0 + $0x20] sm:$0xff]  ;;  %v156_v2 = vsub.s32 0, %v3994_v1 }
  0x82   :  { %2869 = vmatprep.subr.bf16.mxu1 %v2868_v10  ;;  %v2183_v31 = vld [vmem:[%s4284_s3 + $0x160] sm:$0xff]  ;;  %v2184_v32 = vld [vmem:[%s4284_s3 + $0x168] sm:$0xff]  ;;  %v2904_v33 = vpack.c.bf16 %v361_v25, %v360_v24  ;;  %v344_v34 = vld [vmem:[%s4284_s3 + $0x50] sm:$0xff]  ;;  %v2876_v36 = vpack.c.bf16 %v2200_v27, %v2199_v26 }
  0x83   :  { %2165 = vmatmul.mubr.msk.f32.gmra.mrb[4].mxu0 %vm164_vm0, %v134_v3  ;;  %v345_v35 = vld [vmem:[%s4284_s3 + $0x58] sm:$0xff]  ;;  %v362_v37 = vld [vmem:[%s4284_s3 + $0xe0] sm:$0xff]  ;;  %v363_v38 = vld [vmem:[%s4284_s3 + $0xe8] sm:$0xff]  ;;  %v2878_v39 = vpack.c.bf16 %v2184_v32, %v2183_v31 }
  0x84   :  { %271 = vmatprep.mubr.f32.mxu0 %v3529_v0  ;;  %2895 = vmatpush3.bf16.msra.mxu0 %v2894_v4  ;;  %v137_v40 = vld [vmem:[%s4281_s0 + $0x28] sm:$0xff]  ;;  %v2906_v41 = vpack.c.bf16 %v345_v35, %v344_v34  ;;  %v2908_v42 = vpack.c.bf16 %v363_v38, %v362_v37  ;;  %v138_v43 = vld [vmem:[%s4281_s0 + $0x30] sm:$0xff]  ;;  %v139_v44 = vld [vmem:[%s4281_s0 + $0x38] sm:$0xff]  ;;  %v160_v4 = vsub.s32 1, %v3994_v1 }
  0x85   :  { %2897 = vmatprep.subr.bf16.mxu0 %v2896_v7  ;;  %2871 = vmatpush3.bf16.msra.mxu1 %v2870_v15  ;;  %v346_v45 = vld [vmem:[%s4284_s3 + $0x60] sm:$0xff]  ;;  %v347_v46 = vld [vmem:[%s4284_s3 + $0x68] sm:$0xff]  ;;  %v2201_v48 = vld [vmem:[%s4284_s3 + $0x1f0] sm:$0xff] }
  0x86   :  { %2873 = vmatprep.subr.bf16.mxu1 %v2872_v23  ;;  %v2910_v47 = vpack.c.bf16 %v347_v46, %v346_v45  ;;  %v2202_v49 = vld [vmem:[%s4284_s3 + $0x1f8] sm:$0xff]  ;;  %v2185_v51 = vld [vmem:[%s4284_s3 + $0x170] sm:$0xff]  ;;  %v2219_v60 = vld [vmem:[%s4284_s3 + $0x280] sm:$0xff] }
  0x87   :  { %2166 = vmatmul.mubr.msk.f32.gmra.mrb[6].mxu0 %vm164_vm0, %v135_v16  ;;  %v2880_v50 = vpack.c.bf16 %v2202_v49, %v2201_v48  ;;  %v2186_v52 = vld [vmem:[%s4284_s3 + $0x178] sm:$0xff]  ;;  %v364_v53 = vld [vmem:[%s4284_s3 + $0xf0] sm:$0xff]  ;;  %v2220_v61 = vld [vmem:[%s4284_s3 + $0x288] sm:$0xff] }
  0x88   :  { %277 = vmatprep.mubr.f32.mxu0 %v3529_v0  ;;  %2899 = vmatpush3.bf16.msra.mxu0 %v2898_v17  ;;  %v2882_v54 = vpack.c.bf16 %v2186_v52, %v2185_v51  ;;  %v365_v55 = vld [vmem:[%s4284_s3 + $0xf8] sm:$0xff]  ;;  %v348_v56 = vld [vmem:[%s4284_s3 + $0x70] sm:$0xff]  ;;  %v2916_v62 = vpack.c.bf16 %v2220_v61, %v2219_v60  ;;  %v152_v3 = vld [vmem:[%s4283_s2] sm:$0x3] }
  0x89   :  { %2901 = vmatprep.subr.bf16.mxu0 %v2900_v20  ;;  %2875 = vmatpush3.bf16.msra.mxu1 %v2874_v28  ;;  %v349_v57 = vld [vmem:[%s4284_s3 + $0x78] sm:$0xff]  ;;  %v2912_v58 = vpack.c.bf16 %v365_v55, %v364_v53  ;;  %v4003_v5 = vrot.slane %v152_v3, %v156_v2  ;;  %v4007_v6 = vrot.slane %v152_v3, %v160_v4  ;;  %v2203_v10 = vld [vmem:[%s4284_s3 + $0x200] sm:$0xff]  ;;  %v2204_v11 = vld [vmem:[%s4284_s3 + $0x208] sm:$0xff] }
  0x8a   :  { %2877 = vmatprep.subr.bf16.mxu1 %v2876_v36  ;;  %v2914_v59 = vpack.c.bf16 %v349_v57, %v348_v56  ;;  %v2221_v13 = vld [vmem:[%s4284_s3 + $0x290] sm:$0xff]  ;;  %v2222_v14 = vld [vmem:[%s4284_s3 + $0x298] sm:$0xff]  ;;  %v2918_v16 = vpack.c.bf16 %v2204_v11, %v2203_v10  ;;  %v2223_v25 = vld [vmem:[%s4284_s3 + $0x2a0] sm:$0xff] }
  0x8b   :  { %2167 = vmatmul.mubr.msk.f32.gmra.mrb[8].mxu0 %vm164_vm0, %v136_v29  ;;  %v2920_v20 = vpack.c.bf16 %v2222_v14, %v2221_v13  ;;  %v2205_v22 = vld [vmem:[%s4284_s3 + $0x210] sm:$0xff]  ;;  %v2206_v23 = vld [vmem:[%s4284_s3 + $0x218] sm:$0xff]  ;;  %v2224_v26 = vld [vmem:[%s4284_s3 + $0x2a8] sm:$0xff] }
  0x8c   :  { %283 = vmatprep.mubr.f32.mxu0 %v3529_v0  ;;  %2903 = vmatpush3.bf16.msra.mxu0 %v2902_v30  ;;  %v2922_v29 = vpack.c.bf16 %v2206_v23, %v2205_v22  ;;  %v2207_v34 = vld [vmem:[%s4284_s3 + $0x220] sm:$0xff]  ;;  %v2208_v35 = vld [vmem:[%s4284_s3 + $0x228] sm:$0xff]  ;;  %v2225_v37 = vld [vmem:[%s4284_s3 + $0x2b0] sm:$0xff] }
  0x8d   :  { %2905 = vmatprep.subr.bf16.mxu0 %v2904_v33  ;;  %2879 = vmatpush3.bf16.msra.mxu1 %v2878_v39  ;;  %v2924_v33 = vpack.c.bf16 %v2224_v26, %v2223_v25  ;;  %v2226_v38 = vld [vmem:[%s4284_s3 + $0x2b8] sm:$0xff]  ;;  %v2209_v46 = vld [vmem:[%s4284_s3 + $0x230] sm:$0xff]  ;;  %v2227_v49 = vld [vmem:[%s4284_s3 + $0x2c0] sm:$0xff] }
  0x8e   :  { %2881 = vmatprep.subr.bf16.mxu1 %v2880_v50  ;;  %v2928_v45 = vpack.c.bf16 %v2226_v38, %v2225_v37  ;;  %v2228_v50 = vld [vmem:[%s4284_s3 + $0x2c8] sm:$0xff]  ;;  %v2229_v61 = vld [vmem:[%s4284_s3 + $0x2d0] sm:$0xff]  ;;  %v2214_v13 = vld [vmem:[%s4284_s3 + $0x258] sm:$0xff] }
  0x8f   :  { %2168 = vmatmul.mubr.msk.f32.gmra.mrb[10].mxu0 %vm164_vm0, %v137_v40  ;;  %v2932_v57 = vpack.c.bf16 %v2228_v50, %v2227_v49  ;;  %v2216_v25 = vld [vmem:[%s4284_s3 + $0x268] sm:$0xff]  ;;  %v727_v49 = vld [vmem:[#allocation6 + $0xa0] sm:$0xff] }
  0x90   :  { %289 = vmatprep.mubr.f32.mxu0 %v3529_v0  ;;  %2907 = vmatpush3.bf16.msra.mxu0 %v2906_v41  ;;  %v728_v50 = vld [vmem:[#allocation6 + $0xa8] sm:$0xff] }
  0x91   :  { %2909 = vmatprep.subr.bf16.mxu0 %v2908_v42  ;;  %2883 = vmatpush3.bf16.msra.mxu1 %v2882_v54  ;;  %v2926_v42 = vpack.c.bf16 %v2208_v35, %v2207_v34  ;;  %v2217_v34 = vld [vmem:[%s4284_s3 + $0x270] sm:$0xff]  ;;  %v2218_v35 = vld [vmem:[%s4284_s3 + $0x278] sm:$0xff] }
  0x92   :  { %2917 = vmatprep.subr.bf16.mxu1 %v2916_v62  ;;  %v2230_v62 = vld [vmem:[%s4284_s3 + $0x2d8] sm:$0xff]  ;;  %v2946_v37 = vpack.c.bf16 %v2218_v35, %v2217_v34  ;;  %v1037_v35 = vld [vmem:[#allocation8 + $0xe0] sm:$0xff] }
  0x93   :  { %2169 = vmatmul.mubr.msk.f32.gmra.mrb[12].mxu0 %vm164_vm0, %v138_v43  ;;  %v2936_v11 = vpack.c.bf16 %v2230_v62, %v2229_v61  ;;  %v735_v61 = vld [vmem:[#allocation6 + $0xe0] sm:$0xff]  ;;  %v736_v62 = vld [vmem:[#allocation6 + $0xe8] sm:$0xff] }
  0x94   :  { %295 = vmatprep.mubr.f32.mxu0 %v3529_v0  ;;  %2911 = vmatpush3.bf16.msra.mxu0 %v2910_v47  ;;  %v2210_v47 = vld [vmem:[%s4284_s3 + $0x238] sm:$0xff] }
  0x95   :  { %2913 = vmatprep.subr.bf16.mxu0 %v2912_v58  ;;  %v2930_v54 = vpack.c.bf16 %v2210_v47, %v2209_v46  ;;  %v2211_v58 = vld [vmem:[%s4284_s3 + $0x240] sm:$0xff]  ;;  %v724_v46 = vld [vmem:[#allocation6 + $0x88] sm:$0xff] }
  0x97   :  { %2170 = vmatmul.mubr.msk.f32.gmra.mrb[14].mxu0 %vm164_vm0, %v139_v44 }
  0x98   :  { %548 = vmatprep.mubr.f32.mxu0 %v3529_v0  ;;  %2915 = vmatpush3.bf16.msra.mxu0 %v2914_v59  ;;  %v2212_v59 = vld [vmem:[%s4284_s3 + $0x248] sm:$0xff] }
  0x9b   :  { %549 = vmatmul.mubr.f32.vlgmr.msra.gmra.mrb[16].mxu0 %v3529_v0 }
 0x14e   :  { %v255_v7 = vpop.f32.mrb[0].mxu0 }
 0x14f   :  { %v256_v8 = vadd.f32 %v255_v7, %v4003_v5  ;;  %v257_v9 = vpop.f32.mrb[1].mxu0 }
 0x150   :  { %v258_v12 = vadd.f32 %v257_v9, %v4007_v6 }
 0x151   :  { %v302_v18 = vmax.f32 %v256_v8, 0.0  ;;  %v2934_v8 = vpack.c.bf16 %v2212_v59, %v2211_v58  ;;  %v733_v58 = vld [vmem:[#allocation6 + $0xd0] sm:$0xff]  ;;  %v734_v59 = vld [vmem:[#allocation6 + $0xd8] sm:$0xff] }
 0x152   :  { %v303_v15 = vmax.f32 %v258_v12, 0.0  ;;  %v261_v17 = vpop.f32.mrb[2].mxu0  ;;  %v2213_v12 = vld [vmem:[%s4284_s3 + $0x250] sm:$0xff] }
 0x153   :  { %v262_v19 = vadd.f32 %v261_v17, %v4003_v5  ;;  %v263_v21 = vpop.f32.mrb[3].mxu0 }
 0x154   :  { %463 = vmatprep.mubr.f32.mxu1 %v303_v15  ;;  %v264_v24 = vadd.f32 %v263_v21, %v4007_v6  ;;  %v2231_v15 = vld [vmem:[%s4284_s3 + $0x2e0] sm:$0xff] }
 0x155   :  { %464 = vmatmul.mubr.f32.vlgmr.msra.gmra.mrb[0].mxu1 %v302_v18  ;;  %v304_v27 = vmax.f32 %v262_v19, 0.0 }
 0x156   :  { %2919 = vmatpush3.bf16.msra.mxu1 %v2918_v16  ;;  %v305_v28 = vmax.f32 %v264_v24, 0.0  ;;  %v267_v30 = vpop.f32.mrb[4].mxu0  ;;  %v2232_v16 = vld [vmem:[%s4284_s3 + $0x2e8] sm:$0xff]  ;;  %v2215_v24 = vld [vmem:[%s4284_s3 + $0x260] sm:$0xff] }
 0x157   :  { %2921 = vmatprep.subr.bf16.mxu1 %v2920_v20  ;;  %v268_v31 = vadd.f32 %v267_v30, %v4003_v5  ;;  %v269_v32 = vpop.f32.mrb[5].mxu0  ;;  %v2938_v20 = vpack.c.bf16 %v2214_v13, %v2213_v12  ;;  %v2940_v23 = vpack.c.bf16 %v2232_v16, %v2231_v15  ;;  %v1025_v12 = vld [vmem:[#allocation8 + $0x80] sm:$0xff]  ;;  %v1026_v13 = vld [vmem:[#allocation8 + $0x88] sm:$0xff]  ;;  %v1028_v16 = vld [vmem:[#allocation8 + $0x98] sm:$0xff] }
 0x158   :  { %v270_v36 = vadd.f32 %v269_v32, %v4007_v6  ;;  %468 = vmatprep.mubr.f32.mxu1 %v305_v28  ;;  %v2234_v28 = vld [vmem:[%s4284_s3 + $0x2f8] sm:$0xff]  ;;  %v3044_v15 = vpack.c.bf16 %v1026_v13, %v1025_v12 }
 0x159   :  { %v306_v39 = vmax.f32 %v268_v31, 0.0  ;;  %469 = vmatmul.mubr.f32.gmra.mrb[2].mxu1 %v304_v27  ;;  %v2233_v27 = vld [vmem:[%s4284_s3 + $0x2f0] sm:$0xff]  ;;  %v2942_v31 = vpack.c.bf16 %v2216_v25, %v2215_v24  ;;  %v1033_v24 = vld [vmem:[#allocation8 + $0xc0] sm:$0xff]  ;;  %v1034_v25 = vld [vmem:[#allocation8 + $0xc8] sm:$0xff] }
 0x15a   :  { %2923 = vmatpush3.bf16.msra.mxu1 %v2922_v29  ;;  %v307_v40 = vmax.f32 %v270_v36, 0.0  ;;  %v273_v41 = vpop.f32.mrb[6].mxu0 }
 0x15b   :  { %v274_v43 = vadd.f32 %v273_v41, %v4003_v5  ;;  %2925 = vmatprep.subr.bf16.mxu1 %v2924_v33  ;;  %v275_v44 = vpop.f32.mrb[7].mxu0  ;;  %v2944_v33 = vpack.c.bf16 %v2234_v28, %v2233_v27  ;;  %v1035_v28 = vld [vmem:[#allocation8 + $0xd0] sm:$0xff] }
 0x15c   :  { %v276_v48 = vadd.f32 %v275_v44, %v4007_v6  ;;  %473 = vmatprep.mubr.f32.mxu1 %v307_v40 }
 0x15d   :  { %v308_v51 = vmax.f32 %v274_v43, 0.0  ;;  %474 = vmatmul.mubr.f32.gmra.mrb[4].mxu1 %v306_v39 }
 0x15e   :  { %v309_v52 = vmax.f32 %v276_v48, 0.0  ;;  %2927 = vmatpush3.bf16.msra.mxu1 %v2926_v42  ;;  %v279_v53 = vpop.f32.mrb[8].mxu0  ;;  %v726_v48 = vld [vmem:[#allocation6 + $0x98] sm:$0xff] }
 0x15f   :  { %v280_v55 = vadd.f32 %v279_v53, %v4003_v5  ;;  %v281_v56 = vpop.f32.mrb[9].mxu0  ;;  %2929 = vmatprep.subr.bf16.mxu1 %v2928_v45  ;;  %v723_v45 = vld [vmem:[#allocation6 + $0x80] sm:$0xff]  ;;  %v730_v53 = vld [vmem:[#allocation6 + $0xb8] sm:$0xff] }
 0x160   :  { %v282_v60 = vadd.f32 %v281_v56, %v4007_v6  ;;  %478 = vmatprep.mubr.f32.mxu1 %v309_v52  ;;  %v2948_v47 = vpack.c.bf16 %v724_v46, %v723_v45  ;;  %v729_v52 = vld [vmem:[#allocation6 + $0xb0] sm:$0xff]  ;;  %v732_v56 = vld [vmem:[#allocation6 + $0xc8] sm:$0xff] }
 0x161   :  { %v310_v63 = vmax.f32 %v280_v55, 0.0  ;;  %479 = vmatmul.mubr.f32.gmra.mrb[6].mxu1 %v308_v51  ;;  %v2956_v51 = vpack.c.bf16 %v728_v50, %v727_v49  ;;  %v731_v55 = vld [vmem:[#allocation6 + $0xc0] sm:$0xff] }
 0x162   :  { %v311_v3 = vmax.f32 %v282_v60, 0.0  ;;  %2931 = vmatpush3.bf16.msra.mxu1 %v2930_v54  ;;  %v285_v7 = vpop.f32.mrb[10].mxu0  ;;  %2949 = vmatprep.subr.bf16.mxu0 %v2948_v47  ;;  %v2960_v54 = vpack.c.bf16 %v730_v53, %v729_v52  ;;  %v2968_v60 = vpack.c.bf16 %v734_v59, %v733_v58 }
 0x163   :  { %v286_v9 = vadd.f32 %v285_v7, %v4003_v5  ;;  %v287_v10 = vpop.f32.mrb[11].mxu0  ;;  %2933 = vmatprep.subr.bf16.mxu1 %v2932_v57  ;;  %2951 = vmatpush3.bf16.msra.mxu0 %v2948_v47  ;;  %v2964_v57 = vpack.c.bf16 %v732_v56, %v731_v55  ;;  %v738_v7 = vld [vmem:[#allocation6 + $0xf8] sm:$0xff] }
 0x164   :  { %v288_v14 = vadd.f32 %v287_v10, %v4007_v6  ;;  %553 = vmatprep.mubr.f32.mxu0 %v311_v3  ;;  %666 = vmatprep.mubr.f32.mxu1 %v311_v3  ;;  %v737_v3 = vld [vmem:[#allocation6 + $0xf0] sm:$0xff]  ;;  %v707_v10 = vld [vmem:[#allocation6 + $0x8] sm:$0xff] }
 0x165   :  { %v312_v17 = vmax.f32 %v286_v9, 0.0  ;;  %554 = vmatmul.mubr.f32.gmra.mrb[18].mxu0 %v310_v63  ;;  %v706_v9 = vld [vmem:[#allocation6] sm:$0xff] }
 0x166   :  { %v313_v18 = vmax.f32 %v288_v14, 0.0  ;;  %2935 = vmatpush3.bf16.msra.mxu1 %v2934_v8  ;;  %v291_v19 = vpop.f32.mrb[12].mxu0  ;;  %v2976_v8 = vpack.c.bf16 %v738_v7, %v737_v3  ;;  %v1027_v14 = vld [vmem:[#allocation8 + $0x90] sm:$0xff] }
 0x167   :  { %v292_v21 = vadd.f32 %v291_v19, %v4003_v5  ;;  %v293_v22 = vpop.f32.mrb[13].mxu0  ;;  %2937 = vmatprep.subr.bf16.mxu1 %v2936_v11  ;;  %v4118_v11 = vpack.c.bf16 %v707_v10, %v706_v9  ;;  %v1030_v19 = vld [vmem:[#allocation8 + $0xa8] sm:$0xff] }
 0x168   :  { %v294_v26 = vadd.f32 %v293_v22, %v4007_v6  ;;  %558 = vmatprep.mubr.f32.mxu0 %v313_v18  ;;  %v1032_v22 = vld [vmem:[#allocation8 + $0xb8] sm:$0xff] }
 0x169   :  { %v314_v29 = vmax.f32 %v292_v21, 0.0  ;;  %559 = vmatmul.mubr.f32.gmra.mrb[20].mxu0 %v312_v17  ;;  %v1031_v21 = vld [vmem:[#allocation8 + $0xb0] sm:$0xff] }
 0x16a   :  { %v315_v30 = vmax.f32 %v294_v26, 0.0  ;;  %2939 = vmatpush3.bf16.msra.mxu1 %v2938_v20  ;;  %v297_v32 = vpop.f32.mrb[14].mxu0  ;;  %v3060_v26 = vpack.c.bf16 %v1034_v25, %v1033_v24  ;;  %v710_v25 = vld [vmem:[#allocation6 + $0x20] sm:$0xff] }
 0x16b   :  { %2941 = vmatprep.subr.bf16.mxu1 %v2940_v23  ;;  %v299_v36 = vpop.f32.mrb[15].mxu0  ;;  %v298_v39 = vadd.f32 %v297_v32, %v4003_v5  ;;  %v3056_v23 = vpack.c.bf16 %v1032_v22, %v1031_v21 }
 0x16c   :  { %563 = vmatprep.mubr.f32.mxu0 %v315_v30  ;;  %v300_v38 = vadd.f32 %v299_v36, %v4007_v6  ;;  %v725_v6 = vld [vmem:[#allocation6 + $0x90] sm:$0xff]  ;;  %v1038_v36 = vld [vmem:[#allocation8 + $0xe8] sm:$0xff] }
 0x16d   :  { %564 = vmatmul.mubr.f32.gmra.mrb[22].mxu0 %v314_v29  ;;  %v316_v41 = vmax.f32 %v298_v39, 0.0  ;;  %v2952_v5 = vpack.c.bf16 %v726_v48, %v725_v6  ;;  %v3068_v39 = vpack.c.bf16 %v1038_v36, %v1037_v35  ;;  %v716_v35 = vld [vmem:[#allocation6 + $0x50] sm:$0xff]  ;;  %v717_v36 = vld [vmem:[#allocation6 + $0x58] sm:$0xff] }
 0x16e   :  { %2943 = vmatpush3.bf16.msra.mxu1 %v2942_v31  ;;  %v317_v40 = vmax.f32 %v300_v38, 0.0  ;;  %v2319_v42 = vpop.f32.mrb[16].mxu0 }
 0x16f   :  { %2945 = vmatprep.subr.bf16.mxu1 %v2944_v33  ;;  %v2320_v43 = vpop.f32.mrb[17].mxu0  ;;  %2953 = vmatprep.subr.bf16.mxu0 %v2952_v5 }
 0x170   :  { %v4116_v44 = vadd.f32 %v2320_v43, %v2319_v42  ;;  %2955 = vmatpush3.bf16.msra.mxu0 %v2952_v5 }
 0x171   :  { %2957 = vmatprep.subr.bf16.mxu0 %v2956_v51 }
 0x172   :  { %2947 = vmatpush3.bf16.msra.mxu1 %v2946_v37 }
 0x173   :  { %3045 = vmatprep.subr.bf16.mxu1 %v3044_v15 }
 0x174   :  { %2959 = vmatpush3.bf16.msra.mxu0 %v2956_v51 }
 0x175   :  { %667 = vmatmul.mubr.f32.vlgmr.msra.gmra.mrb[8].mxu1 %v310_v63  ;;  %2961 = vmatprep.subr.bf16.mxu0 %v2960_v54  ;;  %v2972_v63 = vpack.c.bf16 %v736_v62, %v735_v61 }
 0x176   :  { %671 = vmatprep.mubr.f32.mxu1 %v313_v18  ;;  %v1029_v18 = vld [vmem:[#allocation8 + $0xa0] sm:$0xff]  ;;  %3047 = vmatpush3.bf16.msra.mxu1 %v3044_v15 }
 0x177   :  { %v3052_v20 = vpack.c.bf16 %v1030_v19, %v1029_v18  ;;  %v709_v18 = vld [vmem:[#allocation6 + $0x18] sm:$0xff] }
 0x178   :  { %2963 = vmatpush3.bf16.msra.mxu0 %v2960_v54 }
 0x179   :  { %672 = vmatmul.mubr.f32.gmra.mrb[10].mxu1 %v312_v17  ;;  %2965 = vmatprep.subr.bf16.mxu0 %v2964_v57  ;;  %v3048_v17 = vpack.c.bf16 %v1028_v16, %v1027_v14 }
 0x17a   :  { %676 = vmatprep.mubr.f32.mxu1 %v315_v30 }
 0x17b   :  { %3049 = vmatprep.subr.bf16.mxu1 %v3048_v17 }
 0x17c   :  { %2967 = vmatpush3.bf16.msra.mxu0 %v2964_v57  ;;  %3051 = vmatpush3.bf16.msra.mxu1 %v3048_v17  ;;  %v708_v17 = vld [vmem:[#allocation6 + $0x10] sm:$0xff] }
 0x17d   :  { %677 = vmatmul.mubr.f32.gmra.mrb[12].mxu1 %v314_v29  ;;  %2969 = vmatprep.subr.bf16.mxu0 %v2968_v60  ;;  %v1036_v29 = vld [vmem:[#allocation8 + $0xd8] sm:$0xff] }
 0x17e   :  { %681 = vmatprep.mubr.f32.mxu1 %v317_v40  ;;  %3053 = vmatprep.subr.bf16.mxu1 %v3052_v20  ;;  %v3064_v32 = vpack.c.bf16 %v1036_v29, %v1035_v28  ;;  %v712_v29 = vld [vmem:[#allocation6 + $0x30] sm:$0xff] }
 0x180   :  { %2971 = vmatpush3.bf16.msra.mxu0 %v2968_v60  ;;  %3055 = vmatpush3.bf16.msra.mxu1 %v3052_v20 }
 0x181   :  { %682 = vmatmul.mubr.f32.gmra.mrb[14].mxu1 %v316_v41  ;;  %2973 = vmatprep.subr.bf16.mxu0 %v2972_v63 }
 0x182   :  { %2758 = vmatprep.mubr.f32.mxu1 %v3529_v0  ;;  %3057 = vmatprep.subr.bf16.mxu1 %v3056_v23 }
 0x184   :  { %2975 = vmatpush3.bf16.msra.mxu0 %v2972_v63  ;;  %3059 = vmatpush3.bf16.msra.mxu1 %v3056_v23  ;;  %v2984_v23 = vpack.c.bf16 %v709_v18, %v708_v17  ;;  %v1341_v18 = vld [vmem:[#allocation10 + $0x100] sm:$0xff] }
 0x185   :  { %2977 = vmatprep.subr.bf16.mxu0 %v2976_v8  ;;  %3061 = vmatprep.subr.bf16.mxu1 %v3060_v26 }
 0x188   :  { %2979 = vmatpush3.bf16.msra.mxu0 %v2976_v8  ;;  %3063 = vmatpush3.bf16.msra.mxu1 %v3060_v26  ;;  %v2235_v8 = vld [vmem:[%s4285_s4] ss:$0 sm:$0xff]  ;;  %v711_v26 = vld [vmem:[#allocation6 + $0x28] sm:$0xff] }
 0x189   :  { %2981 = vmatprep.subr.bf16.mxu0 %v4118_v11  ;;  %3065 = vmatprep.subr.bf16.mxu1 %v3064_v32  ;;  %v2988_v28 = vpack.c.bf16 %v711_v26, %v710_v25  ;;  %v1347_v25 = vld [vmem:[#allocation10 + $0x130] sm:$0xff] }
 0x18c   :  { %3067 = vmatpush3.bf16.msra.mxu1 %v3064_v32  ;;  %v714_v32 = vld [vmem:[#allocation6 + $0x40] sm:$0xff] }
 0x18d   :  { %3069 = vmatprep.subr.bf16.mxu1 %v3068_v39 }
 0x190   :  { %3071 = vmatpush3.bf16.msra.mxu1 %v3068_v39 }
 0x228   :  { %v2275_v27 = vpop.f32.mrb[0].mxu1 }
 0x229   :  { %v2276_v30 = vpop.f32.mrb[1].mxu1 }
 0x22a   :  { %v2277_v31 = vadd.f32 %v2276_v30, %v2275_v27  ;;  %v713_v30 = vld [vmem:[#allocation6 + $0x38] sm:$0xff] }
 0x22c   :  { %v551_v33 = vadd.f32 %v4116_v44, %v2277_v31  ;;  %v2278_v34 = vpop.f32.mrb[2].mxu1  ;;  %v2992_v31 = vpack.c.bf16 %v713_v30, %v712_v29  ;;  %v1349_v29 = vld [vmem:[#allocation10 + $0x140] sm:$0xff]  ;;  %v1351_v30 = vld [vmem:[#allocation10 + $0x150] sm:$0xff] }
 0x22d   :  { %v2279_v37 = vpop.f32.mrb[3].mxu1 }
 0x22e   :  { %v2280_v38 = vadd.f32 %v2279_v37, %v2278_v34  ;;  %v3000_v37 = vpack.c.bf16 %v717_v36, %v716_v35  ;;  %v1353_v36 = vld [vmem:[#allocation10 + $0x160] sm:$0xff] }
 0x230   :  { %v2281_v40 = vpop.f32.mrb[4].mxu1 }
 0x231   :  { %v2282_v41 = vpop.f32.mrb[5].mxu1 }
 0x232   :  { %v2283_v42 = vadd.f32 %v2282_v41, %v2281_v40  ;;  %v720_v40 = vld [vmem:[#allocation6 + $0x70] sm:$0xff]  ;;  %v721_v41 = vld [vmem:[#allocation6 + $0x78] sm:$0xff] }
 0x234   :  { %v2284_v43 = vpop.f32.mrb[6].mxu1 }
 0x235   :  { %v2285_v45 = vpop.f32.mrb[7].mxu1 }
 0x236   :  { %v2286_v46 = vadd.f32 %v2285_v45, %v2284_v43  ;;  %v890_v43 = vld [vmem:[#allocation6 + $0x100] sm:$0xff]  ;;  %v891_v45 = vld [vmem:[#allocation6 + $0x108] sm:$0xff] }
 0x238   :  { %v2322_v47 = vpop.f32.mrb[18].mxu0 }
 0x239   :  { %v2323_v6 = vpop.f32.mrb[19].mxu0 }
 0x23a   :  { %v2324_v44 = vadd.f32 %v2323_v6, %v2322_v47  ;;  %v892_v47 = vld [vmem:[#allocation6 + $0x110] sm:$0xff]  ;;  %v893_v6 = vld [vmem:[#allocation6 + $0x118] sm:$0xff] }
 0x23c   :  { %v556_v48 = vadd.f32 %v2324_v44, %v2280_v38  ;;  %v2325_v5 = vpop.f32.mrb[20].mxu0  ;;  %v718_v38 = vld [vmem:[#allocation6 + $0x60] sm:$0xff]  ;;  %v3016_v44 = vpack.c.bf16 %v893_v6, %v892_v47 }
 0x23d   :  { %v2326_v49 = vpop.f32.mrb[21].mxu0  ;;  %v1361_v6 = vld [vmem:[#allocation10 + $0x1a0] sm:$0xff] }
 0x23e   :  { %v2327_v50 = vadd.f32 %v2326_v49, %v2325_v5  ;;  %v895_v5 = vld [vmem:[#allocation6 + $0x128] sm:$0xff] }
 0x240   :  { %v561_v51 = vadd.f32 %v2327_v50, %v2283_v42  ;;  %v2328_v52 = vpop.f32.mrb[22].mxu0  ;;  %v3008_v42 = vpack.c.bf16 %v721_v41, %v720_v40  ;;  %v896_v50 = vld [vmem:[#allocation6 + $0x130] sm:$0xff]  ;;  %v1357_v41 = vld [vmem:[#allocation10 + $0x180] sm:$0xff] }
 0x241   :  { %v2329_v53 = vpop.f32.mrb[23].mxu0 }
 0x242   :  { %v2330_v54 = vadd.f32 %v2329_v53, %v2328_v52  ;;  %v898_v53 = vld [vmem:[#allocation6 + $0x140] sm:$0xff] }
 0x244   :  { %v566_v55 = vadd.f32 %v2330_v54, %v2286_v46  ;;  %v3012_v46 = vpack.c.bf16 %v891_v45, %v890_v43  ;;  %v899_v54 = vld [vmem:[#allocation6 + $0x148] sm:$0xff] }
 0x245   :  { %v1362_v45 = vld [vmem:[#allocation10 + $0x1a8] sm:$0xff] }
 0x248   :  { %v2363_v56 = vpop.f32.mrb[8].mxu1 }
 0x249   :  { %v2364_v57 = vpop.f32.mrb[9].mxu1 }
 0x24a   :  { %v2365_v58 = vadd.f32 %v2364_v57, %v2363_v56  ;;  %v900_v56 = vld [vmem:[#allocation6 + $0x150] sm:$0xff]  ;;  %v901_v57 = vld [vmem:[#allocation6 + $0x158] sm:$0xff] }
 0x24c   :  { %v687_v59 = vadd.f32 %v2365_v58, %v551_v33  ;;  %v2366_v60 = vpop.f32.mrb[10].mxu1  ;;  %v715_v33 = vld [vmem:[#allocation6 + $0x48] sm:$0xff]  ;;  %v3032_v58 = vpack.c.bf16 %v901_v57, %v900_v56 }
 0x24d   :  { %v2367_v61 = vpop.f32.mrb[11].mxu1  ;;  %v2996_v34 = vpack.c.bf16 %v715_v33, %v714_v32  ;;  %v3150_v32 = vpack.c.bf16 %v1351_v30, %v1349_v29  ;;  %v1354_v33 = vld [vmem:[#allocation10 + $0x168] sm:$0xff]  ;;  %v1219_v29 = vld [vmem:[#allocation8 + $0x118] sm:$0xff] }
 0x24e   :  { %v2368_v62 = vadd.f32 %v2367_v61, %v2366_v60  ;;  %v698_v16 = vadd.f32 %v2235_v8, %v687_v59  ;;  %v902_v59 = vld [vmem:[#allocation6 + $0x160] sm:$0xff]  ;;  %v903_v60 = vld [vmem:[#allocation6 + $0x168] sm:$0xff] }
 0x24f   :  { %v3036_v61 = vpack.c.bf16 %v903_v60, %v902_v59  ;;  %v1007_v59 = vld [vmem:[#allocation8 + $0x18] sm:$0xff] }
 0x250   :  { %v688_v63 = vadd.f32 %v2368_v62, %v556_v48  ;;  %v2369_v3 = vpop.f32.mrb[12].mxu1  ;;  %v702_v24 = vmax.f32 %v698_v16, 0.0  ;;  %v894_v48 = vld [vmem:[#allocation6 + $0x120] sm:$0xff]  ;;  %v904_v62 = vld [vmem:[#allocation6 + $0x170] sm:$0xff]  ;;  %v1344_v16 = vld [vmem:[#allocation10 + $0x118] sm:$0xff] }
 0x251   :  { %v2370_v7 = vpop.f32.mrb[13].mxu1  ;;  %v3020_v49 = vpack.c.bf16 %v895_v5, %v894_v48  ;;  %v1366_v5 = vld [vmem:[#allocation10 + $0x1c8] sm:$0xff] }
 0x252   :  { %v2371_v9 = vadd.f32 %v2370_v7, %v2369_v3  ;;  %v699_v10 = vadd.f32 %v2235_v8, %v688_v63  ;;  %v905_v63 = vld [vmem:[#allocation6 + $0x178] sm:$0xff] }
 0x253   :  { %v3040_v3 = vpack.c.bf16 %v905_v63, %v904_v62 }
 0x254   :  { %v689_v12 = vadd.f32 %v2371_v9, %v561_v51  ;;  %v2372_v13 = vpop.f32.mrb[14].mxu1  ;;  %v703_v14 = vmax.f32 %v699_v10, 0.0  ;;  %v897_v51 = vld [vmem:[#allocation6 + $0x138] sm:$0xff] }
 0x255   :  { %v2373_v15 = vpop.f32.mrb[15].mxu1  ;;  %v3024_v52 = vpack.c.bf16 %v897_v51, %v896_v50  ;;  %v1040_v9 = vld [vmem:[#allocation8 + $0xf8] sm:$0xff]  ;;  %v1365_v51 = vld [vmem:[#allocation10 + $0x1c0] sm:$0xff] }
 0x256   :  { %v700_v19 = vadd.f32 %v2235_v8, %v689_v12  ;;  %v2374_v20 = vadd.f32 %v2373_v15, %v2372_v13  ;;  %2653 = vmatprep.mubr.f32.mxu0 %v703_v14  ;;  %v1004_v12 = vld [vmem:[#allocation8] sm:$0xff]  ;;  %v1005_v13 = vld [vmem:[#allocation8 + $0x8] sm:$0xff] }
 0x257   :  { %v1342_v15 = vld [vmem:[#allocation10 + $0x108] sm:$0xff] }
 0x258   :  { %v704_v21 = vmax.f32 %v700_v19, 0.0  ;;  %v690_v22 = vadd.f32 %v2374_v20, %v566_v55  ;;  %v3028_v55 = vpack.c.bf16 %v899_v54, %v898_v53  ;;  %v3140_v17 = vpack.c.bf16 %v1344_v16, %v1342_v15  ;;  %v1343_v19 = vld [vmem:[#allocation10 + $0x110] sm:$0xff]  ;;  %v2236_v54 = vld [vmem:[%s4287_s6] ss:$0 sm:$0xff]  ;;  %v1013_v15 = vld [vmem:[#allocation8 + $0x48] sm:$0xff] }
 0x259   :  { %v3142_v20 = vpack.c.bf16 %v1343_v19, %v1341_v18  ;;  %v1016_v19 = vld [vmem:[#allocation8 + $0x60] sm:$0xff] }
 0x25a   :  { %v4125_v27 = vadd.f32 %v2235_v8, %v690_v22  ;;  %2654 = vmatmul.mubr.f32.vlgmr.msra.gmra.mrb[24].mxu0 %v704_v21  ;;  %v1039_v8 = vld [vmem:[#allocation8 + $0xf0] sm:$0xff]  ;;  %v1348_v22 = vld [vmem:[#allocation10 + $0x138] sm:$0xff] }
 0x25b   :  { %2983 = vmatpush3.bf16.msra.mxu0 %v4118_v11  ;;  %2688 = vmatprep.mubr.f32.mxu0 %v702_v24  ;;  %v719_v11 = vld [vmem:[#allocation6 + $0x68] sm:$0xff]  ;;  %v3072_v10 = vpack.c.bf16 %v1040_v9, %v1039_v8  ;;  %v1010_v9 = vld [vmem:[#allocation8 + $0x30] sm:$0xff] }
 0x25c   :  { %2985 = vmatprep.subr.bf16.mxu0 %v2984_v23  ;;  %v3004_v39 = vpack.c.bf16 %v719_v11, %v718_v38  ;;  %v705_v7 = vmax.f32 %v4125_v27, 0.0  ;;  %v1350_v27 = vld [vmem:[#allocation10 + $0x148] sm:$0xff] }
 0x25d   :  { %3073 = vmatprep.subr.bf16.mxu1 %v3072_v10  ;;  %v1358_v11 = vld [vmem:[#allocation10 + $0x188] sm:$0xff] }
 0x25e   :  { %3075 = vmatpush3.bf16.msra.mxu1 %v3072_v10  ;;  %v1011_v10 = vld [vmem:[#allocation8 + $0x38] sm:$0xff] }
 0x25f   :  { %2987 = vmatpush3.bf16.msra.mxu0 %v2984_v23  ;;  %v1345_v23 = vld [vmem:[#allocation10 + $0x120] sm:$0xff] }
 0x260   :  { %2989 = vmatprep.subr.bf16.mxu0 %v2988_v28  ;;  %v3146_v26 = vpack.c.bf16 %v1347_v25, %v1345_v23  ;;  %v1019_v23 = vld [vmem:[#allocation8 + $0x78] sm:$0xff]  ;;  %v1216_v25 = vld [vmem:[#allocation8 + $0x100] sm:$0xff] }
 0x263   :  { %2991 = vmatpush3.bf16.msra.mxu0 %v2988_v28  ;;  %v1352_v28 = vld [vmem:[#allocation10 + $0x158] sm:$0xff] }
 0x264   :  { %2993 = vmatprep.subr.bf16.mxu0 %v2992_v31 }
 0x267   :  { %2995 = vmatpush3.bf16.msra.mxu0 %v2992_v31  ;;  %v3148_v31 = vpack.c.bf16 %v1352_v28, %v1350_v27  ;;  %v1218_v28 = vld [vmem:[#allocation8 + $0x110] sm:$0xff] }
 0x268   :  { %2997 = vmatprep.subr.bf16.mxu0 %v2996_v34  ;;  %v3112_v30 = vpack.c.bf16 %v1219_v29, %v1218_v28  ;;  %v1543_v28 = vld [vmem:[#allocation10 + $0xc0] sm:$0xff]  ;;  %v1545_v29 = vld [vmem:[#allocation10 + $0xd0] sm:$0xff] }
 0x26b   :  { %2999 = vmatpush3.bf16.msra.mxu0 %v2996_v34  ;;  %v1356_v34 = vld [vmem:[#allocation10 + $0x178] sm:$0xff] }
 0x26c   :  { %3001 = vmatprep.subr.bf16.mxu0 %v3000_v37  ;;  %v3152_v35 = vpack.c.bf16 %v1356_v34, %v1354_v33  ;;  %v1222_v34 = vld [vmem:[#allocation8 + $0x130] sm:$0xff] }
 0x26f   :  { %3003 = vmatpush3.bf16.msra.mxu0 %v3000_v37  ;;  %v1355_v37 = vld [vmem:[#allocation10 + $0x170] sm:$0xff] }
 0x270   :  { %3005 = vmatprep.subr.bf16.mxu0 %v3004_v39  ;;  %v3154_v38 = vpack.c.bf16 %v1355_v37, %v1353_v36  ;;  %v1224_v37 = vld [vmem:[#allocation8 + $0x140] sm:$0xff] }
 0x273   :  { %3007 = vmatpush3.bf16.msra.mxu0 %v3004_v39  ;;  %v1360_v39 = vld [vmem:[#allocation10 + $0x198] sm:$0xff] }
 0x274   :  { %3009 = vmatprep.subr.bf16.mxu0 %v3008_v42  ;;  %v3156_v40 = vpack.c.bf16 %v1360_v39, %v1358_v11  ;;  %v1226_v39 = vld [vmem:[#allocation8 + $0x150] sm:$0xff] }
 0x277   :  { %3011 = vmatpush3.bf16.msra.mxu0 %v3008_v42  ;;  %v1359_v42 = vld [vmem:[#allocation10 + $0x190] sm:$0xff] }
 0x278   :  { %3013 = vmatprep.subr.bf16.mxu0 %v3012_v46  ;;  %v3158_v43 = vpack.c.bf16 %v1359_v42, %v1357_v41  ;;  %v1228_v42 = vld [vmem:[#allocation8 + $0x160] sm:$0xff] }
 0x27a   :  { %2689 = vmatmul.mubr.f32.vlgmr.msra.gmra.mrb[24].mxu0 %v703_v14  ;;  %v4130_v14 = vpack.c.bf16 %v1005_v13, %v1004_v12  ;;  %v3088_v12 = vpack.c.bf16 %v1011_v10, %v1010_v9  ;;  %v1012_v13 = vld [vmem:[#allocation8 + $0x40] sm:$0xff] }
 0x27b   :  { %3015 = vmatpush3.bf16.msra.mxu0 %v3012_v46  ;;  %2723 = vmatprep.mubr.f32.mxu0 %v704_v21  ;;  %v1346_v21 = vld [vmem:[#allocation10 + $0x128] sm:$0xff]  ;;  %v1364_v46 = vld [vmem:[#allocation10 + $0x1b8] sm:$0xff]  ;;  %v3092_v16 = vpack.c.bf16 %v1013_v15, %v1012_v13  ;;  %v1533_v13 = vld [vmem:[#allocation10 + $0x70] sm:$0xff] }
 0x27c   :  { %3017 = vmatprep.subr.bf16.mxu0 %v3016_v44  ;;  %3077 = vmatprep.subr.bf16.mxu1 %v4130_v14  ;;  %v3144_v24 = vpack.c.bf16 %v1348_v22, %v1346_v21  ;;  %v3160_v47 = vpack.c.bf16 %v1364_v46, %v1362_v45  ;;  %v1018_v22 = vld [vmem:[#allocation8 + $0x70] sm:$0xff]  ;;  %v1536_v15 = vld [vmem:[#allocation10 + $0x88] sm:$0xff] }
 0x27d   :  { %v1230_v46 = vld [vmem:[#allocation8 + $0x170] sm:$0xff] }
 0x27f   :  { %3019 = vmatpush3.bf16.msra.mxu0 %v3016_v44  ;;  %v1363_v44 = vld [vmem:[#allocation10 + $0x1b0] sm:$0xff] }
 0x280   :  { %3021 = vmatprep.subr.bf16.mxu0 %v3020_v49  ;;  %v3162_v48 = vpack.c.bf16 %v1363_v44, %v1361_v6  ;;  %v1520_v44 = vld [vmem:[#allocation10 + $0x8] sm:$0xff] }
 0x283   :  { %3023 = vmatpush3.bf16.msra.mxu0 %v3020_v49  ;;  %v1368_v49 = vld [vmem:[#allocation10 + $0x1d8] sm:$0xff] }
 0x284   :  { %3025 = vmatprep.subr.bf16.mxu0 %v3024_v52  ;;  %v3164_v50 = vpack.c.bf16 %v1368_v49, %v1366_v5  ;;  %v1519_v49 = vld [vmem:[#allocation10] sm:$0xff] }
 0x287   :  { %3027 = vmatpush3.bf16.msra.mxu0 %v3024_v52  ;;  %v1367_v52 = vld [vmem:[#allocation10 + $0x1d0] sm:$0xff] }
 0x288   :  { %3029 = vmatprep.subr.bf16.mxu0 %v3028_v55  ;;  %v3166_v53 = vpack.c.bf16 %v1367_v52, %v1365_v51  ;;  %v1524_v51 = vld [vmem:[#allocation10 + $0x28] sm:$0xff]  ;;  %v1526_v52 = vld [vmem:[#allocation10 + $0x38] sm:$0xff] }
 0x28b   :  { %3031 = vmatpush3.bf16.msra.mxu0 %v3028_v55 }
 0x28c   :  { %3033 = vmatprep.subr.bf16.mxu0 %v3032_v58 }
 0x28f   :  { %3035 = vmatpush3.bf16.msra.mxu0 %v3032_v58  ;;  %v1006_v58 = vld [vmem:[#allocation8 + $0x10] sm:$0xff] }
 0x290   :  { %3037 = vmatprep.subr.bf16.mxu0 %v3036_v61  ;;  %v3080_v62 = vpack.c.bf16 %v1007_v59, %v1006_v58  ;;  %v1530_v58 = vld [vmem:[#allocation10 + $0x58] sm:$0xff] }
 0x293   :  { %3039 = vmatpush3.bf16.msra.mxu0 %v3036_v61 }
 0x294   :  { %3041 = vmatprep.subr.bf16.mxu0 %v3040_v3 }
 0x297   :  { %3043 = vmatpush3.bf16.msra.mxu0 %v3040_v3  ;;  %v1008_v3 = vld [vmem:[#allocation8 + $0x20] sm:$0xff] }
 0x298   :  { %3141 = vmatprep.subr.bf16.mxu0 %v3140_v17  ;;  %v1014_v17 = vld [vmem:[#allocation8 + $0x50] sm:$0xff] }
 0x29a   :  { %2724 = vmatmul.mubr.f32.vlgmr.msra.gmra.mrb[24].mxu0 %v705_v7  ;;  %v1009_v7 = vld [vmem:[#allocation8 + $0x28] sm:$0xff] }
 0x29b   :  { %1449 = vmatprep.mubr.f32.mxu0 %v3529_v0  ;;  %3143 = vmatpush1.bf16.msra.mxu0 %v3142_v20  ;;  %v3084_v8 = vpack.c.bf16 %v1009_v7, %v1008_v3  ;;  %v1017_v20 = vld [vmem:[#allocation8 + $0x68] sm:$0xff]  ;;  %v1529_v3 = vld [vmem:[#allocation10 + $0x50] sm:$0xff] }
 0x29c   :  { %3145 = vmatprep.subr.bf16.mxu0 %v3144_v24  ;;  %v3100_v21 = vpack.c.bf16 %v1017_v20, %v1016_v19  ;;  %v3104_v24 = vpack.c.bf16 %v1019_v23, %v1018_v22  ;;  %v1532_v7 = vld [vmem:[#allocation10 + $0x68] sm:$0xff]  ;;  %v1542_v20 = vld [vmem:[#allocation10 + $0xb8] sm:$0xff]  ;;  %v1539_v22 = vld [vmem:[#allocation10 + $0xa0] sm:$0xff] }
 0x29d   :  { %v1540_v19 = vld [vmem:[#allocation10 + $0xa8] sm:$0xff]  ;;  %v1541_v23 = vld [vmem:[#allocation10 + $0xb0] sm:$0xff] }
 0x29f   :  { %3147 = vmatpush1.bf16.msra.mxu0 %v3146_v26  ;;  %v1217_v26 = vld [vmem:[#allocation8 + $0x108] sm:$0xff] }
 0x2a0   :  { %3149 = vmatprep.subr.bf16.mxu0 %v3148_v31  ;;  %v3108_v27 = vpack.c.bf16 %v1217_v26, %v1216_v25  ;;  %v1220_v31 = vld [vmem:[#allocation8 + $0x120] sm:$0xff]  ;;  %v1546_v25 = vld [vmem:[#allocation10 + $0xd8] sm:$0xff]  ;;  %v3194_v26 = vpack.c.bf16 %v1541_v23, %v1539_v22 }
 0x2a1   :  { %v1499_v23 = vld [vmem:[#allocation10 + $0x280] sm:$0xff] }
 0x2a3   :  { %3151 = vmatpush1.bf16.msra.mxu0 %v3150_v32  ;;  %v1221_v32 = vld [vmem:[#allocation8 + $0x128] sm:$0xff] }
 0x2a4   :  { %3153 = vmatprep.subr.bf16.mxu0 %v3152_v35  ;;  %v3116_v33 = vpack.c.bf16 %v1221_v32, %v1220_v31  ;;  %v1223_v35 = vld [vmem:[#allocation8 + $0x138] sm:$0xff]  ;;  %v1548_v31 = vld [vmem:[#allocation10 + $0xe8] sm:$0xff] }
 0x2a5   :  { %v3120_v36 = vpack.c.bf16 %v1223_v35, %v1222_v34  ;;  %v1550_v32 = vld [vmem:[#allocation10 + $0xf8] sm:$0xff]  ;;  %v1547_v34 = vld [vmem:[#allocation10 + $0xe0] sm:$0xff]  ;;  %v1549_v35 = vld [vmem:[#allocation10 + $0xf0] sm:$0xff] }
 0x2a7   :  { %3155 = vmatpush1.bf16.msra.mxu0 %v3154_v38  ;;  %v1225_v38 = vld [vmem:[#allocation8 + $0x148] sm:$0xff] }
 0x2a8   :  { %3157 = vmatprep.subr.bf16.mxu0 %v3156_v40  ;;  %v3124_v11 = vpack.c.bf16 %v1225_v38, %v1224_v37  ;;  %v1227_v40 = vld [vmem:[#allocation8 + $0x158] sm:$0xff]  ;;  %v1370_v37 = vld [vmem:[#allocation10 + $0x1e8] sm:$0xff] }
 0x2a9   :  { %v3128_v41 = vpack.c.bf16 %v1227_v40, %v1226_v39  ;;  %v1372_v38 = vld [vmem:[#allocation10 + $0x1f8] sm:$0xff]  ;;  %v1369_v39 = vld [vmem:[#allocation10 + $0x1e0] sm:$0xff]  ;;  %v1371_v40 = vld [vmem:[#allocation10 + $0x1f0] sm:$0xff] }
 0x2ab   :  { %3159 = vmatpush1.bf16.msra.mxu0 %v3158_v43  ;;  %v1229_v43 = vld [vmem:[#allocation8 + $0x168] sm:$0xff] }
 0x2ac   :  { %3161 = vmatprep.subr.bf16.mxu0 %v3160_v47  ;;  %v3132_v45 = vpack.c.bf16 %v1229_v43, %v1228_v42  ;;  %v1231_v47 = vld [vmem:[#allocation8 + $0x178] sm:$0xff]  ;;  %v1484_v42 = vld [vmem:[#allocation10 + $0x208] sm:$0xff] }
 0x2ad   :  { %v3136_v6 = vpack.c.bf16 %v1231_v47, %v1230_v46  ;;  %v1486_v43 = vld [vmem:[#allocation10 + $0x218] sm:$0xff]  ;;  %v2237_v46 = vld [vmem:[%s4289_s8] ss:$0 sm:$0xff] }
 0x2ae   :  { %v1483_v47 = vld [vmem:[#allocation10 + $0x200] sm:$0xff] }
 0x2af   :  { %3163 = vmatpush1.bf16.msra.mxu0 %v3162_v48  ;;  %v1522_v48 = vld [vmem:[#allocation10 + $0x18] sm:$0xff] }
 0x2b0   :  { %3165 = vmatprep.subr.bf16.mxu0 %v3164_v50  ;;  %v3172_v5 = vpack.c.bf16 %v1522_v48, %v1520_v44  ;;  %v1521_v50 = vld [vmem:[#allocation10 + $0x10] sm:$0xff]  ;;  %v1488_v48 = vld [vmem:[#allocation10 + $0x228] sm:$0xff] }
 0x2b3   :  { %3167 = vmatpush1.bf16.msra.mxu0 %v3166_v53  ;;  %v3174_v53 = vpack.c.bf16 %v1521_v50, %v1519_v49 }
 0x36d   :  { %v2725_v55 = vpop.f32.mrb[24].mxu0 }
 0x36e   :  { %v991_v56 = vadd.f32 %v2725_v55, %v2236_v54  ;;  %v972_v57 = vpop.f32.mrb[25].mxu0  ;;  %v1523_v55 = vld [vmem:[#allocation10 + $0x20] sm:$0xff] }
 0x36f   :  { %v990_v60 = vadd.f32 %v2236_v54, %v972_v57  ;;  %v3176_v54 = vpack.c.bf16 %v1526_v52, %v1524_v51  ;;  %v1528_v57 = vld [vmem:[#allocation10 + $0x48] sm:$0xff] }
 0x370   :  { %v4138_v63 = vmax.f32 %v991_v56, 0.0  ;;  %v1525_v56 = vld [vmem:[#allocation10 + $0x30] sm:$0xff] }
 0x371   :  { %v4136_v61 = vmax.f32 %v990_v60, 0.0  ;;  %v3178_v59 = vpack.c.bf16 %v1525_v56, %v1523_v55  ;;  %v3180_v60 = vpack.c.bf16 %v1530_v58, %v1528_v57  ;;  %v1487_v55 = vld [vmem:[#allocation10 + $0x220] sm:$0xff]  ;;  %v1489_v56 = vld [vmem:[#allocation10 + $0x230] sm:$0xff] }
 0x373   :  { %2759 = vmatmul.mubr.f32.vlgmr.msra.gmra.mrb[16].mxu1 %v4136_v61 }
 0x374   :  { %3079 = vmatpush3.bf16.msra.mxu1 %v4130_v14  ;;  %2761 = vmatprep.mubr.f32.mxu1 %v4138_v63  ;;  %v1015_v14 = vld [vmem:[#allocation8 + $0x58] sm:$0xff] }
 0x375   :  { %3081 = vmatprep.subr.bf16.mxu1 %v3080_v62  ;;  %v3096_v18 = vpack.c.bf16 %v1015_v14, %v1014_v17  ;;  %v1535_v14 = vld [vmem:[#allocation10 + $0x80] sm:$0xff] }
 0x377   :  { %2762 = vmatmul.mubr.f32.gmra.mrb[18].mxu1 %v3529_v0 }
 0x378   :  { %3083 = vmatpush3.bf16.msra.mxu1 %v3080_v62  ;;  %2796 = vmatprep.mubr.f32.mxu1 %v4136_v61  ;;  %v1527_v62 = vld [vmem:[#allocation10 + $0x40] sm:$0xff] }
 0x379   :  { %3085 = vmatprep.subr.bf16.mxu1 %v3084_v8  ;;  %v3182_v9 = vpack.c.bf16 %v1529_v3, %v1527_v62 }
 0x37c   :  { %3087 = vmatpush3.bf16.msra.mxu1 %v3084_v8  ;;  %v1534_v8 = vld [vmem:[#allocation10 + $0x78] sm:$0xff] }
 0x37d   :  { %3089 = vmatprep.subr.bf16.mxu1 %v3088_v12  ;;  %v3184_v10 = vpack.c.bf16 %v1534_v8, %v1532_v7  ;;  %v3210_v7 = vpack.c.bf16 %v1489_v56, %v1487_v55  ;;  %v2016_v55 = vld [vmem:[#allocation14 + $0xa8] sm:$0xff] }
 0x380   :  { %3091 = vmatpush3.bf16.msra.mxu1 %v3088_v12  ;;  %v1531_v12 = vld [vmem:[#allocation10 + $0x60] sm:$0xff] }
 0x381   :  { %3093 = vmatprep.subr.bf16.mxu1 %v3092_v16 }
 0x384   :  { %3095 = vmatpush3.bf16.msra.mxu1 %v3092_v16  ;;  %v3186_v16 = vpack.c.bf16 %v1533_v13, %v1531_v12  ;;  %v1496_v13 = vld [vmem:[#allocation10 + $0x268] sm:$0xff] }
 0x385   :  { %3097 = vmatprep.subr.bf16.mxu1 %v3096_v18 }
 0x388   :  { %3099 = vmatpush3.bf16.msra.mxu1 %v3096_v18  ;;  %v1537_v18 = vld [vmem:[#allocation10 + $0x90] sm:$0xff] }
 0x389   :  { %3101 = vmatprep.subr.bf16.mxu1 %v3100_v21 }
 0x38c   :  { %3103 = vmatpush3.bf16.msra.mxu1 %v3100_v21  ;;  %v3192_v21 = vpack.c.bf16 %v1542_v20, %v1540_v19  ;;  %v1500_v19 = vld [vmem:[#allocation10 + $0x288] sm:$0xff]  ;;  %v1502_v20 = vld [vmem:[#allocation10 + $0x298] sm:$0xff] }
 0x38d   :  { %3105 = vmatprep.subr.bf16.mxu1 %v3104_v24  ;;  %v3220_v22 = vpack.c.bf16 %v1502_v20, %v1500_v19  ;;  %v2005_v19 = vld [vmem:[#allocation14 + $0x50] sm:$0xff] }
 0x390   :  { %3107 = vmatpush3.bf16.msra.mxu1 %v3104_v24  ;;  %v1544_v24 = vld [vmem:[#allocation10 + $0xc8] sm:$0xff] }
 0x391   :  { %3109 = vmatprep.subr.bf16.mxu1 %v3108_v27 }
 0x393   :  { %2797 = vmatmul.mubr.f32.vlgmr.msra.gmra.mrb[16].mxu1 %v4138_v63 }
 0x394   :  { %3111 = vmatpush3.bf16.msra.mxu1 %v3108_v27  ;;  %2799 = vmatprep.mubr.f32.mxu1 %v3529_v0  ;;  %v3196_v27 = vpack.c.bf16 %v1546_v25, %v1544_v24  ;;  %v1501_v24 = vld [vmem:[#allocation10 + $0x290] sm:$0xff]  ;;  %v1504_v25 = vld [vmem:[#allocation10 + $0x2a8] sm:$0xff] }
 0x395   :  { %3113 = vmatprep.subr.bf16.mxu1 %v3112_v30 }
 0x397   :  { %2800 = vmatmul.mubr.f32.gmra.mrb[18].mxu1 %v3529_v0 }
 0x398   :  { %3115 = vmatpush3.bf16.msra.mxu1 %v3112_v30  ;;  %2834 = vmatprep.mubr.f32.mxu1 %v3529_v0  ;;  %v3198_v30 = vpack.c.bf16 %v1545_v29, %v1543_v28  ;;  %v1503_v29 = vld [vmem:[#allocation10 + $0x2a0] sm:$0xff] }
 0x399   :  { %3117 = vmatprep.subr.bf16.mxu1 %v3116_v33 }
 0x39c   :  { %3119 = vmatpush3.bf16.msra.mxu1 %v3116_v33  ;;  %v3200_v33 = vpack.c.bf16 %v1550_v32, %v1548_v31  ;;  %v1508_v31 = vld [vmem:[#allocation10 + $0x2c8] sm:$0xff]  ;;  %v1510_v32 = vld [vmem:[#allocation10 + $0x2d8] sm:$0xff] }
 0x39d   :  { %3121 = vmatprep.subr.bf16.mxu1 %v3120_v36 }
 0x3a0   :  { %3123 = vmatpush3.bf16.msra.mxu1 %v3120_v36  ;;  %v3202_v36 = vpack.c.bf16 %v1549_v35, %v1547_v34  ;;  %v3228_v34 = vpack.c.bf16 %v1510_v32, %v1508_v31  ;;  %v1507_v35 = vld [vmem:[#allocation10 + $0x2c0] sm:$0xff]  ;;  %v2025_v32 = vld [vmem:[#allocation14 + $0xf0] sm:$0xff] }
 0x3a1   :  { %3125 = vmatprep.subr.bf16.mxu1 %v3124_v11 }
 0x3a4   :  { %3127 = vmatpush3.bf16.msra.mxu1 %v3124_v11  ;;  %v3168_v11 = vpack.c.bf16 %v1372_v38, %v1370_v37  ;;  %v1512_v37 = vld [vmem:[#allocation10 + $0x2e8] sm:$0xff]  ;;  %v1514_v38 = vld [vmem:[#allocation10 + $0x2f8] sm:$0xff] }
 0x3a5   :  { %3129 = vmatprep.subr.bf16.mxu1 %v3128_v41 }
 0x3a6   :  { %3169 = vmatprep.subr.bf16.mxu0 %v3168_v11 }
 0x3a8   :  { %3131 = vmatpush3.bf16.msra.mxu1 %v3128_v41  ;;  %v3170_v41 = vpack.c.bf16 %v1371_v40, %v1369_v39  ;;  %v3232_v39 = vpack.c.bf16 %v1514_v38, %v1512_v37  ;;  %v1511_v40 = vld [vmem:[#allocation10 + $0x2e0] sm:$0xff]  ;;  %v2009_v37 = vld [vmem:[#allocation14 + $0x70] sm:$0xff] }
 0x3a9   :  { %3133 = vmatprep.subr.bf16.mxu1 %v3132_v45 }
 0x3aa   :  { %3171 = vmatpush1.bf16.msra.mxu0 %v3170_v41  ;;  %v1513_v41 = vld [vmem:[#allocation10 + $0x2f0] sm:$0xff] }
 0x3ac   :  { %3135 = vmatpush3.bf16.msra.mxu1 %v3132_v45  ;;  %v3204_v45 = vpack.c.bf16 %v1486_v43, %v1484_v42  ;;  %v2011_v42 = vld [vmem:[#allocation14 + $0x80] sm:$0xff]  ;;  %v2012_v43 = vld [vmem:[#allocation14 + $0x88] sm:$0xff] }
 0x3ad   :  { %3137 = vmatprep.subr.bf16.mxu1 %v3136_v6 }
 0x3b0   :  { %3139 = vmatpush3.bf16.msra.mxu1 %v3136_v6  ;;  %v1485_v6 = vld [vmem:[#allocation10 + $0x210] sm:$0xff] }
 0x3b1   :  { %3173 = vmatprep.subr.bf16.mxu1 %v3172_v5  ;;  %v1490_v5 = vld [vmem:[#allocation10 + $0x238] sm:$0xff]  ;;  %v3206_v52 = vpack.c.bf16 %v1485_v6, %v1483_v47  ;;  %v1995_v47 = vld [vmem:[#allocation14] sm:$0xff]  ;;  %v1996_v6 = vld [vmem:[#allocation14 + $0x8] sm:$0xff] }
 0x3b3   :  { %2835 = vmatmul.mubr.f32.vlgmr.msra.gmra.mrb[16].mxu1 %v3529_v0 }
 0x3b4   :  { %2837 = vmatprep.mubr.f32.mxu1 %v4136_v61  ;;  %3175 = vmatpush1.bf16.msra.mxu1 %v3174_v53  ;;  %v1538_v61 = vld [vmem:[#allocation10 + $0x98] sm:$0xff] }
 0x3b5   :  { %3177 = vmatprep.subr.bf16.mxu1 %v3176_v54  ;;  %v3188_v17 = vpack.c.bf16 %v1538_v61, %v1536_v15  ;;  %v3208_v54 = vpack.c.bf16 %v1490_v5, %v1488_v48  ;;  %v1498_v15 = vld [vmem:[#allocation10 + $0x278] sm:$0xff]  ;;  %v3302_v5 = vpack.c.bf16 %v1996_v6, %v1995_v47  ;;  %v1789_v47 = vld [vmem:[#allocation13 + $0x20] sm:$0xff]  ;;  %v1790_v6 = vld [vmem:[#allocation13 + $0x28] sm:$0xff] }
 0x3b6   :  { %v2014_v48 = vld [vmem:[#allocation14 + $0x98] sm:$0xff] }
 0x3b7   :  { %2838 = vmatmul.mubr.f32.gmra.mrb[18].mxu1 %v4138_v63  ;;  %v3190_v63 = vpack.c.bf16 %v1537_v18, %v1535_v14  ;;  %v1495_v14 = vld [vmem:[#allocation10 + $0x260] sm:$0xff]  ;;  %v1497_v18 = vld [vmem:[#allocation10 + $0x270] sm:$0xff] }
 0x3b8   :  { %3179 = vmatpush1.bf16.msra.mxu1 %v3178_v59  ;;  %1615 = vmatprep.mubr.f32.mxu1 %v3529_v0  ;;  %v1492_v59 = vld [vmem:[#allocation10 + $0x248] sm:$0xff] }
 0x3b9   :  { %3181 = vmatprep.subr.bf16.mxu1 %v3180_v60  ;;  %v1494_v60 = vld [vmem:[#allocation10 + $0x258] sm:$0xff] }
 0x3ba   :  { %v3212_v8 = vpack.c.bf16 %v1494_v60, %v1492_v59  ;;  %v1999_v59 = vld [vmem:[#allocation14 + $0x20] sm:$0xff]  ;;  %v2000_v60 = vld [vmem:[#allocation14 + $0x28] sm:$0xff] }
 0x3bc   :  { %3183 = vmatpush1.bf16.msra.mxu1 %v3182_v9  ;;  %v1491_v9 = vld [vmem:[#allocation10 + $0x240] sm:$0xff] }
 0x3bd   :  { %3185 = vmatprep.subr.bf16.mxu1 %v3184_v10  ;;  %v1493_v10 = vld [vmem:[#allocation10 + $0x250] sm:$0xff] }
 0x3c0   :  { %3187 = vmatpush1.bf16.msra.mxu1 %v3186_v16  ;;  %v3214_v16 = vpack.c.bf16 %v1493_v10, %v1491_v9  ;;  %v2019_v9 = vld [vmem:[#allocation14 + $0xc0] sm:$0xff]  ;;  %v2020_v10 = vld [vmem:[#allocation14 + $0xc8] sm:$0xff] }
 0x3c1   :  { %3189 = vmatprep.subr.bf16.mxu1 %v3188_v17  ;;  %v3216_v17 = vpack.c.bf16 %v1498_v15, %v1496_v13  ;;  %v3316_v15 = vpack.c.bf16 %v2020_v10, %v2019_v9  ;;  %v1813_v9 = vld [vmem:[#allocation13 + $0xe0] sm:$0xff]  ;;  %v1814_v10 = vld [vmem:[#allocation13 + $0xe8] sm:$0xff] }
 0x3c4   :  { %3191 = vmatpush1.bf16.msra.mxu1 %v3190_v63 }
 0x3c5   :  { %3193 = vmatprep.subr.bf16.mxu1 %v3192_v21  ;;  %v3218_v21 = vpack.c.bf16 %v1497_v18, %v1495_v14 }
 0x3c8   :  { %3195 = vmatpush1.bf16.msra.mxu1 %v3194_v26  ;;  %v1506_v26 = vld [vmem:[#allocation10 + $0x2b8] sm:$0xff] }
 0x3c9   :  { %3197 = vmatprep.subr.bf16.mxu1 %v3196_v27  ;;  %v3222_v27 = vpack.c.bf16 %v1501_v24, %v1499_v23  ;;  %v3224_v28 = vpack.c.bf16 %v1506_v26, %v1504_v25  ;;  %v1801_v24 = vld [vmem:[#allocation13 + $0x80] sm:$0xff]  ;;  %v1802_v25 = vld [vmem:[#allocation13 + $0x88] sm:$0xff] }
 0x3ca   :  { %v2007_v26 = vld [vmem:[#allocation14 + $0x60] sm:$0xff] }
 0x3cc   :  { %3199 = vmatpush1.bf16.msra.mxu1 %v3198_v30  ;;  %v1505_v30 = vld [vmem:[#allocation10 + $0x2b0] sm:$0xff] }
 0x3cd   :  { %3201 = vmatprep.subr.bf16.mxu1 %v3200_v33  ;;  %v3226_v33 = vpack.c.bf16 %v1505_v30, %v1503_v29  ;;  %v1785_v29 = vld [vmem:[#allocation13] sm:$0xff] }
 0x3d0   :  { %3203 = vmatpush1.bf16.msra.mxu1 %v3202_v36  ;;  %v1509_v36 = vld [vmem:[#allocation10 + $0x2d0] sm:$0xff] }
 0x3d1   :  { %3205 = vmatprep.subr.bf16.mxu1 %v3204_v45  ;;  %v3230_v11 = vpack.c.bf16 %v1509_v36, %v1507_v35  ;;  %v3234_v45 = vpack.c.bf16 %v1513_v41, %v1511_v40  ;;  %v1803_v35 = vld [vmem:[#allocation13 + $0x90] sm:$0xff]  ;;  %v1804_v36 = vld [vmem:[#allocation13 + $0x98] sm:$0xff] }
 0x3d2   :  { %v3240_v38 = vpack.c.bf16 %v1804_v36, %v1803_v35  ;;  %v1788_v40 = vld [vmem:[#allocation13 + $0x18] sm:$0xff] }
 0x486   :  { %v2836_v44 = vpop.f32.mrb[16].mxu1 }
 0x487   :  { %v1329_v49 = vadd.f32 %v2836_v44, %v2237_v46  ;;  %v1298_v50 = vpop.f32.mrb[17].mxu1  ;;  %v2013_v44 = vld [vmem:[#allocation14 + $0x90] sm:$0xff] }
 0x488   :  { %v4156_v51 = vadd.f32 %v2237_v46, %v1298_v50  ;;  %v1997_v50 = vld [vmem:[#allocation14 + $0x10] sm:$0xff] }
 0x489   :  { %v4158_v53 = vmax.f32 %v1329_v49, 0.0  ;;  %v3304_v49 = vpack.c.bf16 %v2014_v48, %v2013_v44  ;;  %v3246_v44 = vpack.c.bf16 %v1790_v6, %v1789_v47  ;;  %v1807_v48 = vld [vmem:[#allocation13 + $0xb0] sm:$0xff]  ;;  %v1754_v47 = vld [vmem:[#allocation11 + $0x8] sm:$0xff] }
 0x48a   :  { %v1332_v57 = vmax.f32 %v4156_v51, 0.0  ;;  %v2839_v58 = vpop.f32.mrb[18].mxu1  ;;  %v2001_v51 = vld [vmem:[#allocation14 + $0x30] sm:$0xff] }
 0x48b   :  { %v1308_v62 = vpop.f32.mrb[19].mxu1  ;;  %1616 = vmatmul.mubr.f32.vlgmr.msra.gmra.mrb[20].mxu1 %v4158_v53  ;;  %v1331_v61 = vadd.f32 %v2839_v58, %v2237_v46 }
 0x48c   :  { %v1330_v3 = vadd.f32 %v2237_v46, %v1308_v62  ;;  %3207 = vmatpush1.bf16.msra.mxu1 %v3206_v52  ;;  %1450 = vmatmul.mubr.f32.vlgmr.msra.gmra.mrb[26].mxu0 %v1332_v57  ;;  %v3300_v46 = vpack.c.bf16 %v2012_v43, %v2011_v42  ;;  %v1998_v52 = vld [vmem:[#allocation14 + $0x18] sm:$0xff]  ;;  %v2017_v62 = vld [vmem:[#allocation14 + $0xb0] sm:$0xff]  ;;  %v1805_v43 = vld [vmem:[#allocation13 + $0xa0] sm:$0xff] }
 0x48d   :  { %3209 = vmatprep.subr.bf16.mxu1 %v3208_v54  ;;  %1455 = vmatprep.mubr.f32.mxu0 %v3529_v0  ;;  %v4172_v63 = vmax.f32 %v1331_v61, 0.0  ;;  %v2015_v54 = vld [vmem:[#allocation14 + $0xa0] sm:$0xff]  ;;  %v3306_v56 = vpack.c.bf16 %v1998_v52, %v1997_v50  ;;  %v1791_v50 = vld [vmem:[#allocation13 + $0x30] sm:$0xff]  ;;  %v1792_v52 = vld [vmem:[#allocation13 + $0x38] sm:$0xff] }
 0x48e   :  { %v4165_v12 = vmax.f32 %v1330_v3, 0.0  ;;  %1621 = vmatprep.mubr.f32.mxu1 %v3529_v0  ;;  %v3308_v58 = vpack.c.bf16 %v2016_v55, %v2015_v54  ;;  %v2018_v3 = vld [vmem:[#allocation14 + $0xb8] sm:$0xff]  ;;  %v2003_v61 = vld [vmem:[#allocation14 + $0x40] sm:$0xff]  ;;  %v3250_v54 = vpack.c.bf16 %v1792_v52, %v1791_v50 }
 0x48f   :  { %v1809_v55 = vld [vmem:[#allocation13 + $0xc0] sm:$0xff] }
 0x490   :  { %3211 = vmatpush1.bf16.msra.mxu1 %v3210_v7  ;;  %1456 = vmatmul.mubr.f32.gmra.mrb[28].mxu0 %v4158_v53  ;;  %v3310_v7 = vpack.c.bf16 %v2000_v60, %v1999_v59  ;;  %v1793_v59 = vld [vmem:[#allocation13 + $0x40] sm:$0xff]  ;;  %v1794_v60 = vld [vmem:[#allocation13 + $0x48] sm:$0xff] }
 0x491   :  { %1622 = vmatmul.mubr.f32.gmra.mrb[22].mxu1 %v4165_v12  ;;  %3213 = vmatprep.subr.bf16.mxu1 %v3212_v8  ;;  %v3312_v8 = vpack.c.bf16 %v2018_v3, %v2017_v62  ;;  %v1811_v62 = vld [vmem:[#allocation13 + $0xd0] sm:$0xff]  ;;  %v3254_v3 = vpack.c.bf16 %v1794_v60, %v1793_v59  ;;  %v1773_v60 = vld [vmem:[#allocation11 + $0xa0] sm:$0xff] }
 0x492   :  { %1461 = vmatprep.mubr.f32.mxu0 %v3529_v0  ;;  %1627 = vmatprep.mubr.f32.mxu1 %v3529_v0 }
 0x494   :  { %3215 = vmatpush1.bf16.msra.mxu1 %v3214_v16  ;;  %1462 = vmatmul.mubr.f32.gmra.mrb[30].mxu0 %v4165_v12  ;;  %v2021_v16 = vld [vmem:[#allocation14 + $0xd0] sm:$0xff] }
 0x495   :  { %1628 = vmatmul.mubr.f32.gmra.mrb[24].mxu1 %v4172_v63  ;;  %3217 = vmatprep.subr.bf16.mxu1 %v3216_v17  ;;  %v2022_v17 = vld [vmem:[#allocation14 + $0xd8] sm:$0xff] }
 0x496   :  { %1467 = vmatprep.mubr.f32.mxu0 %v3529_v0  ;;  %1633 = vmatprep.mubr.f32.mxu1 %v3529_v0  ;;  %v3320_v18 = vpack.c.bf16 %v2022_v17, %v2021_v16  ;;  %v1815_v17 = vld [vmem:[#allocation13 + $0xf0] sm:$0xff] }
 0x498   :  { %3219 = vmatpush1.bf16.msra.mxu1 %v3218_v21  ;;  %1468 = vmatmul.mubr.f32.gmra.mrb[32].mxu0 %v4172_v63  ;;  %v2023_v21 = vld [vmem:[#allocation14 + $0xe0] sm:$0xff] }
 0x499   :  { %3221 = vmatprep.subr.bf16.mxu1 %v3220_v22  ;;  %1634 = vmatmul.mubr.f32.gmra.mrb[26].mxu1 %v3529_v0  ;;  %v2024_v22 = vld [vmem:[#allocation14 + $0xe8] sm:$0xff] }
 0x49a   :  { %1704 = vmatprep.mubr.f32.mxu1 %v3529_v0  ;;  %v3324_v23 = vpack.c.bf16 %v2024_v22, %v2023_v21  ;;  %v1769_v21 = vld [vmem:[#allocation11 + $0x80] sm:$0xff]  ;;  %v1770_v22 = vld [vmem:[#allocation11 + $0x88] sm:$0xff] }
 0x49c   :  { %3223 = vmatpush1.bf16.msra.mxu1 %v3222_v27  ;;  %v3236_v27 = vpack.c.bf16 %v1802_v25, %v1801_v24  ;;  %v1373_v24 = vld [vmem:[%s4291_s10] sm:$0x3] }
 0x49d   :  { %3225 = vmatprep.subr.bf16.mxu1 %v3224_v28  ;;  %v2008_v28 = vld [vmem:[#allocation14 + $0x68] sm:$0xff] }
 0x49e   :  { %v3326_v30 = vpack.c.bf16 %v2008_v28, %v2007_v26  ;;  %3237 = vmatprep.subr.bf16.mxu0 %v3236_v27  ;;  %v4198_v27 = vrot.slane %v1373_v24, %v156_v2  ;;  %v4202_v28 = vrot.slane %v1373_v24, %v160_v4 }
 0x4a0   :  { %3227 = vmatpush1.bf16.msra.mxu1 %v3226_v33  ;;  %v2026_v33 = vld [vmem:[#allocation14 + $0xf8] sm:$0xff] }
 0x4a1   :  { %3229 = vmatprep.subr.bf16.mxu1 %v3228_v34  ;;  %v3328_v34 = vpack.c.bf16 %v2026_v33, %v2025_v32 }
 0x4a4   :  { %3231 = vmatpush1.bf16.msra.mxu1 %v3230_v11  ;;  %v2010_v11 = vld [vmem:[#allocation14 + $0x78] sm:$0xff] }
 0x4a5   :  { %3233 = vmatprep.subr.bf16.mxu1 %v3232_v39  ;;  %v1787_v39 = vld [vmem:[#allocation13 + $0x10] sm:$0xff]  ;;  %v3330_v41 = vpack.c.bf16 %v2010_v11, %v2009_v37 }
 0x4a6   :  { %v3242_v42 = vpack.c.bf16 %v1788_v40, %v1787_v39 }
 0x4a8   :  { %3235 = vmatpush1.bf16.msra.mxu1 %v3234_v45  ;;  %v1806_v45 = vld [vmem:[#allocation13 + $0xa8] sm:$0xff] }
 0x4a9   :  { %3301 = vmatprep.subr.bf16.mxu1 %v3300_v46  ;;  %v3244_v46 = vpack.c.bf16 %v1806_v45, %v1805_v43 }
 0x4ab   :  { %1705 = vmatmul.mubr.f32.vlgmr.msra.gmra.mrb[20].mxu1 %v1332_v57  ;;  %v2002_v57 = vld [vmem:[#allocation14 + $0x38] sm:$0xff] }
 0x4ac   :  { %1710 = vmatprep.mubr.f32.mxu1 %v3529_v0  ;;  %3303 = vmatpush3.bf16.msra.mxu1 %v3302_v5  ;;  %v3314_v13 = vpack.c.bf16 %v2002_v57, %v2001_v51  ;;  %v1808_v5 = vld [vmem:[#allocation13 + $0xb8] sm:$0xff] }
 0x4ad   :  { %3305 = vmatprep.subr.bf16.mxu1 %v3304_v49  ;;  %v3248_v49 = vpack.c.bf16 %v1808_v5, %v1807_v48  ;;  %v1796_v51 = vld [vmem:[#allocation13 + $0x58] sm:$0xff] }
 0x4ae   :  { %v1772_v48 = vld [vmem:[#allocation11 + $0x98] sm:$0xff] }
 0x4af   :  { %1711 = vmatmul.mubr.f32.gmra.mrb[22].mxu1 %v4158_v53  ;;  %v2004_v53 = vld [vmem:[#allocation14 + $0x48] sm:$0xff] }
 0x4b0   :  { %1716 = vmatprep.mubr.f32.mxu1 %v3529_v0  ;;  %3307 = vmatpush3.bf16.msra.mxu1 %v3306_v56  ;;  %v3318_v14 = vpack.c.bf16 %v2004_v53, %v2003_v61  ;;  %v1810_v56 = vld [vmem:[#allocation13 + $0xc8] sm:$0xff]  ;;  %v1797_v61 = vld [vmem:[#allocation13 + $0x60] sm:$0xff] }
 0x4b1   :  { %3309 = vmatprep.subr.bf16.mxu1 %v3308_v58  ;;  %v3252_v58 = vpack.c.bf16 %v1810_v56, %v1809_v55  ;;  %v1798_v53 = vld [vmem:[#allocation13 + $0x68] sm:$0xff] }
 0x4b2   :  { %v3262_v16 = vpack.c.bf16 %v1798_v53, %v1797_v61  ;;  %v1775_v53 = vld [vmem:[#allocation11 + $0xb0] sm:$0xff] }
 0x4b3   :  { %1717 = vmatmul.mubr.f32.gmra.mrb[24].mxu1 %v4165_v12  ;;  %v2006_v12 = vld [vmem:[#allocation14 + $0x58] sm:$0xff] }
 0x4b4   :  { %1722 = vmatprep.mubr.f32.mxu1 %v3529_v0  ;;  %3311 = vmatpush3.bf16.msra.mxu1 %v3310_v7  ;;  %v3322_v20 = vpack.c.bf16 %v2006_v12, %v2005_v19  ;;  %v1812_v7 = vld [vmem:[#allocation13 + $0xd8] sm:$0xff]  ;;  %v1799_v19 = vld [vmem:[#allocation13 + $0x70] sm:$0xff] }
 0x4b5   :  { %3313 = vmatprep.subr.bf16.mxu1 %v3312_v8  ;;  %v1795_v8 = vld [vmem:[#allocation13 + $0x50] sm:$0xff]  ;;  %v3256_v57 = vpack.c.bf16 %v1812_v7, %v1811_v62  ;;  %v1800_v12 = vld [vmem:[#allocation13 + $0x78] sm:$0xff]  ;;  %v1774_v62 = vld [vmem:[#allocation11 + $0xa8] sm:$0xff] }
 0x4b7   :  { %1723 = vmatmul.mubr.f32.gmra.mrb[26].mxu1 %v4172_v63  ;;  %v1786_v63 = vld [vmem:[#allocation13 + $0x8] sm:$0xff] }
 0x4b8   :  { %3315 = vmatpush3.bf16.msra.mxu1 %v3314_v13  ;;  %v3238_v31 = vpack.c.bf16 %v1786_v63, %v1785_v29  ;;  %v3258_v13 = vpack.c.bf16 %v1796_v51, %v1795_v8 }
 0x4b9   :  { %3317 = vmatprep.subr.bf16.mxu1 %v3316_v15  ;;  %v3260_v15 = vpack.c.bf16 %v1814_v10, %v1813_v9  ;;  %v3276_v10 = vpack.c.bf16 %v1774_v62, %v1773_v60  ;;  %v1767_v60 = vld [vmem:[#allocation11 + $0x70] sm:$0xff]  ;;  %v1768_v62 = vld [vmem:[#allocation11 + $0x78] sm:$0xff] }
 0x4ba   :  { %3239 = vmatpush3.bf16.msra.mxu0 %v3238_v31 }
 0x4bb   :  { %3241 = vmatprep.subr.bf16.mxu0 %v3240_v38 }
 0x4bc   :  { %3319 = vmatpush3.bf16.msra.mxu1 %v3318_v14  ;;  %v1816_v14 = vld [vmem:[#allocation13 + $0xf8] sm:$0xff] }
 0x4bd   :  { %3321 = vmatprep.subr.bf16.mxu1 %v3320_v18  ;;  %v3264_v18 = vpack.c.bf16 %v1816_v14, %v1815_v17 }
 0x4be   :  { %3243 = vmatpush3.bf16.msra.mxu0 %v3242_v42 }
 0x4bf   :  { %3245 = vmatprep.subr.bf16.mxu0 %v3244_v46  ;;  %v1753_v46 = vld [vmem:[#allocation11] sm:$0xff] }
 0x4c0   :  { %3323 = vmatpush3.bf16.msra.mxu1 %v3322_v20  ;;  %v3266_v20 = vpack.c.bf16 %v1800_v12, %v1799_v19  ;;  %v3270_v50 = vpack.c.bf16 %v1754_v47, %v1753_v46  ;;  %v1779_v47 = vld [vmem:[#allocation11 + $0xd0] sm:$0xff] }
 0x4c1   :  { %3325 = vmatprep.subr.bf16.mxu1 %v3324_v23  ;;  %v3268_v23 = vpack.c.bf16 %v1770_v22, %v1769_v21  ;;  %v1759_v22 = vld [vmem:[#allocation11 + $0x30] sm:$0xff] }
 0x4c2   :  { %3247 = vmatpush3.bf16.msra.mxu0 %v3246_v44  ;;  %v1771_v44 = vld [vmem:[#allocation11 + $0x90] sm:$0xff] }
 0x4c3   :  { %3249 = vmatprep.subr.bf16.mxu0 %v3248_v49  ;;  %v3272_v56 = vpack.c.bf16 %v1772_v48, %v1771_v44  ;;  %v1763_v44 = vld [vmem:[#allocation11 + $0x50] sm:$0xff]  ;;  %v1764_v48 = vld [vmem:[#allocation11 + $0x58] sm:$0xff] }
 0x4c4   :  { %3327 = vmatpush3.bf16.msra.mxu1 %v3326_v30 }
 0x4c5   :  { %3329 = vmatprep.subr.bf16.mxu1 %v3328_v34 }
 0x4c6   :  { %3251 = vmatpush3.bf16.msra.mxu0 %v3250_v54 }
 0x4c7   :  { %3253 = vmatprep.subr.bf16.mxu0 %v3252_v58  ;;  %v1755_v58 = vld [vmem:[#allocation11 + $0x10] sm:$0xff] }
 0x4c8   :  { %3331 = vmatpush3.bf16.msra.mxu1 %v3330_v41 }
 0x4ca   :  { %3255 = vmatpush3.bf16.msra.mxu0 %v3254_v3 }
 0x4cb   :  { %3257 = vmatprep.subr.bf16.mxu0 %v3256_v57 }
 0x4ce   :  { %3259 = vmatpush3.bf16.msra.mxu0 %v3258_v13  ;;  %v1757_v13 = vld [vmem:[#allocation11 + $0x20] sm:$0xff] }
 0x4cf   :  { %3261 = vmatprep.subr.bf16.mxu0 %v3260_v15  ;;  %v1758_v15 = vld [vmem:[#allocation11 + $0x28] sm:$0xff] }
 0x4d2   :  { %3263 = vmatpush3.bf16.msra.mxu0 %v3262_v16  ;;  %v1776_v16 = vld [vmem:[#allocation11 + $0xb8] sm:$0xff] }
 0x4d3   :  { %3265 = vmatprep.subr.bf16.mxu0 %v3264_v18  ;;  %v3278_v18 = vpack.c.bf16 %v1758_v15, %v1757_v13  ;;  %v3280_v21 = vpack.c.bf16 %v1776_v16, %v1775_v53 }
 0x4d6   :  { %3267 = vmatpush3.bf16.msra.mxu0 %v3266_v20 }
 0x4d7   :  { %3269 = vmatprep.subr.bf16.mxu0 %v3268_v23  ;;  %v1760_v23 = vld [vmem:[#allocation11 + $0x38] sm:$0xff] }
 0x55f   :  { %v4192_v25 = vpop.f32.mrb[26].mxu0 }
 0x560   :  { %v4194_v26 = vpop.f32.mrb[27].mxu0 }
 0x561   :  { %v1454_v24 = vadd.f32 %v4194_v26, %v4202_v28 }
 0x563   :  { %v1457_v29 = vpop.f32.mrb[28].mxu0  ;;  %v1475_v46 = vmax.f32 %v1454_v24, 0.0 }
 0x564   :  { %v4205_v63 = vadd.f32 %v1457_v29, %v4198_v27  ;;  %v1459_v30 = vpop.f32.mrb[29].mxu0 }
 0x565   :  { %v4208_v31 = vadd.f32 %v1459_v30, %v4202_v28  ;;  %v1777_v30 = vld [vmem:[#allocation11 + $0xc0] sm:$0xff] }
 0x566   :  { %v1476_v34 = vmax.f32 %v4205_v63, 0.0 }
 0x567   :  { %v1477_v32 = vmax.f32 %v4208_v31, 0.0  ;;  %v1463_v33 = vpop.f32.mrb[30].mxu0 }
 0x568   :  { %v4213_v2 = vadd.f32 %v1463_v33, %v4198_v27  ;;  %v1465_v35 = vpop.f32.mrb[31].mxu0  ;;  %v1778_v33 = vld [vmem:[#allocation11 + $0xc8] sm:$0xff] }
 0x569   :  { %v4216_v1 = vadd.f32 %v1465_v35, %v4202_v28  ;;  %2091 = vmatprep.mubr.f32.mxu1 %v1477_v32 }
 0x56a   :  { %2092 = vmatmul.mubr.f32.vlgmr.msra.gmra.mrb[28].mxu1 %v1476_v34  ;;  %v1478_v37 = vmax.f32 %v4213_v2, 0.0 }
 0x56b   :  { %v1479_v4 = vmax.f32 %v4216_v1, 0.0  ;;  %v1469_v36 = vpop.f32.mrb[32].mxu0 }
 0x56c   :  { %v4225_v38 = vadd.f32 %v1469_v36, %v4198_v27  ;;  %v1471_v11 = vpop.f32.mrb[33].mxu0  ;;  %v3282_v36 = vpack.c.bf16 %v1760_v23, %v1759_v22 }
 0x56d   :  { %v4228_v39 = vadd.f32 %v1471_v11, %v4202_v28  ;;  %2096 = vmatprep.mubr.f32.mxu1 %v1479_v4 }
 0x56e   :  { %2097 = vmatmul.mubr.f32.gmra.mrb[30].mxu1 %v1478_v37  ;;  %v1480_v41 = vmax.f32 %v4225_v38, 0.0 }
 0x56f   :  { %v1481_v40 = vmax.f32 %v4228_v39, 0.0 }
 0x571   :  { %2101 = vmatprep.mubr.f32.mxu1 %v1481_v40 }
 0x572   :  { %2102 = vmatmul.mubr.f32.gmra.mrb[32].mxu1 %v1480_v41 }
 0x573   :  { %2106 = vmatprep.mubr.f32.mxu1 %v3529_v0 }
 0x576   :  { %2107 = vmatmul.mubr.f32.gmra.mrb[34].mxu1 %v3529_v0  ;;  %v1756_v0 = vld [vmem:[#allocation11 + $0x18] sm:$0xff] }
 0x577   :  { %v3274_v8 = vpack.c.bf16 %v1756_v0, %v1755_v58  ;;  %v1784_v58 = vld [vmem:[#allocation11 + $0xf8] sm:$0xff] }
 0x57e   :  { %v1706_v42 = vpop.f32.mrb[20].mxu1 }
 0x57f   :  { %v1729_v43 = vadd.f32 %v1706_v42, %v4198_v27  ;;  %v1708_v45 = vpop.f32.mrb[21].mxu1  ;;  %v3284_v42 = vpack.c.bf16 %v1778_v33, %v1777_v30 }
 0x580   :  { %v1730_v6 = vadd.f32 %v1708_v45, %v4202_v28  ;;  %v1762_v45 = vld [vmem:[#allocation11 + $0x48] sm:$0xff] }
 0x581   :  { %v1737_v52 = vmax.f32 %v1729_v43, 0.0  ;;  %v1761_v43 = vld [vmem:[#allocation11 + $0x40] sm:$0xff] }
 0x582   :  { %v1738_v5 = vmax.f32 %v1730_v6, 0.0  ;;  %v1712_v49 = vpop.f32.mrb[22].mxu1  ;;  %v1780_v6 = vld [vmem:[#allocation11 + $0xd8] sm:$0xff]  ;;  %v3286_v26 = vpack.c.bf16 %v1762_v45, %v1761_v43 }
 0x583   :  { %v1731_v54 = vadd.f32 %v1712_v49, %v4198_v27  ;;  %v1714_v55 = vpop.f32.mrb[23].mxu1  ;;  %v1782_v49 = vld [vmem:[#allocation11 + $0xe8] sm:$0xff] }
 0x584   :  { %v1732_v59 = vadd.f32 %v1714_v55, %v4202_v28  ;;  %1881 = vmatprep.mubr.f32.mxu0 %v1738_v5  ;;  %v1781_v5 = vld [vmem:[#allocation11 + $0xe0] sm:$0xff]  ;;  %v1766_v55 = vld [vmem:[#allocation11 + $0x68] sm:$0xff] }
 0x585   :  { %1882 = vmatmul.mubr.f32.vlgmr.msra.gmra.mrb[34].mxu0 %v1737_v52  ;;  %v1739_v51 = vmax.f32 %v1731_v54, 0.0  ;;  %v3292_v52 = vpack.c.bf16 %v1782_v49, %v1781_v5  ;;  %v1765_v54 = vld [vmem:[#allocation11 + $0x60] sm:$0xff] }
 0x586   :  { %v1740_v3 = vmax.f32 %v1732_v59, 0.0  ;;  %3271 = vmatpush3.bf16.msra.mxu0 %v3270_v50  ;;  %v1718_v7 = vpop.f32.mrb[24].mxu1  ;;  %v3290_v50 = vpack.c.bf16 %v1764_v48, %v1763_v44  ;;  %v3294_v0 = vpack.c.bf16 %v1766_v55, %v1765_v54 }
 0x587   :  { %v1733_v57 = vadd.f32 %v1718_v7, %v4198_v27  ;;  %v1720_v9 = vpop.f32.mrb[25].mxu1  ;;  %3273 = vmatprep.subr.bf16.mxu0 %v3272_v56  ;;  %v1783_v56 = vld [vmem:[#allocation11 + $0xf0] sm:$0xff]  ;;  %v1452_v7 = vadd.f32 %v4192_v25, %v4198_v27 }
 0x588   :  { %v1734_v61 = vadd.f32 %v1720_v9, %v4202_v28  ;;  %1886 = vmatprep.mubr.f32.mxu0 %v1740_v3  ;;  %v3296_v59 = vpack.c.bf16 %v1784_v58, %v1783_v56  ;;  %v3298_v3 = vpack.c.bf16 %v1768_v62, %v1767_v60 }
 0x589   :  { %1887 = vmatmul.mubr.f32.gmra.mrb[36].mxu0 %v1739_v51  ;;  %v1741_v19 = vmax.f32 %v1733_v57, 0.0 }
 0x58a   :  { %v1742_v17 = vmax.f32 %v1734_v61, 0.0  ;;  %3275 = vmatpush3.bf16.msra.mxu0 %v3274_v8  ;;  %v1724_v14 = vpop.f32.mrb[26].mxu1  ;;  %v1474_v8 = vmax.f32 %v1452_v7, 0.0 }
 0x58b   :  { %v1735_v12 = vadd.f32 %v1724_v14, %v4198_v27  ;;  %v1726_v20 = vpop.f32.mrb[27].mxu1  ;;  %3277 = vmatprep.subr.bf16.mxu0 %v3276_v10 }
 0x58c   :  { %v1736_v29 = vadd.f32 %v1726_v20, %v4202_v28  ;;  %1891 = vmatprep.mubr.f32.mxu0 %v1742_v17  ;;  %v3288_v28 = vpack.c.bf16 %v1780_v6, %v1779_v47 }
 0x58d   :  { %1892 = vmatmul.mubr.f32.gmra.mrb[38].mxu0 %v1741_v19  ;;  %v1743_v11 = vmax.f32 %v1735_v12, 0.0 }
 0x58e   :  { %v1744_v35 = vmax.f32 %v1736_v29, 0.0  ;;  %3279 = vmatpush3.bf16.msra.mxu0 %v3278_v18 }
 0x58f   :  { %3281 = vmatprep.subr.bf16.mxu0 %v3280_v21  ;;  %v2238_v21 = vld [vmem:[%s4295_s14] ss:$0 sm:$0xff] }
 0x590   :  { %1896 = vmatprep.mubr.f32.mxu0 %v1744_v35 }
 0x591   :  { %1897 = vmatmul.mubr.f32.gmra.mrb[40].mxu0 %v1743_v11 }
 0x592   :  { %3283 = vmatpush3.bf16.msra.mxu0 %v3282_v36  ;;  %1966 = vmatprep.mubr.f32.mxu0 %v1475_v46 }
 0x593   :  { %3285 = vmatprep.subr.bf16.mxu0 %v3284_v42 }
 0x596   :  { %3287 = vmatpush3.bf16.msra.mxu0 %v3286_v26 }
 0x597   :  { %3289 = vmatprep.subr.bf16.mxu0 %v3288_v28 }
 0x59a   :  { %3291 = vmatpush3.bf16.msra.mxu0 %v3290_v50 }
 0x59b   :  { %3293 = vmatprep.subr.bf16.mxu0 %v3292_v52 }
 0x59e   :  { %3295 = vmatpush3.bf16.msra.mxu0 %v3294_v0 }
 0x59f   :  { %3297 = vmatprep.subr.bf16.mxu0 %v3296_v59 }
 0x5a2   :  { %3299 = vmatpush3.bf16.msra.mxu0 %v3298_v3 }
 0x5a5   :  { %1967 = vmatmul.mubr.f32.vlgmr.msra.gmra.mrb[42].mxu0 %v1474_v8 }
 0x5a6   :  { %1971 = vmatprep.mubr.f32.mxu0 %v1477_v32 }
 0x5a9   :  { %1972 = vmatmul.mubr.f32.gmra.mrb[44].mxu0 %v1476_v34 }
 0x5aa   :  { %1976 = vmatprep.mubr.f32.mxu0 %v1479_v4 }
 0x5ad   :  { %1977 = vmatmul.mubr.f32.gmra.mrb[46].mxu0 %v1478_v37 }
 0x5ae   :  { %1981 = vmatprep.mubr.f32.mxu0 %v1481_v40 }
 0x5b1   :  { %1982 = vmatmul.mubr.f32.gmra.mrb[48].mxu0 %v1480_v41 }
 0x63d   :  { %v2609_v25 = vpop.f32.mrb[28].mxu1 }
 0x63e   :  { %v2610_v27 = vpop.f32.mrb[29].mxu1 }
 0x63f   :  { %v2611_v51 = vadd.f32 %v2610_v27, %v2609_v25 }
 0x641   :  { %v2612_v31 = vpop.f32.mrb[30].mxu1 }
 0x642   :  { %v2613_v32 = vpop.f32.mrb[31].mxu1 }
 0x643   :  { %v2614_v57 = vadd.f32 %v2613_v32, %v2612_v31 }
 0x645   :  { %v2615_v63 = vpop.f32.mrb[32].mxu1 }
 0x646   :  { %v2616_v34 = vpop.f32.mrb[33].mxu1 }
 0x647   :  { %v2617_v9 = vadd.f32 %v2616_v34, %v2615_v63 }
 0x649   :  { %v2618_v1 = vpop.f32.mrb[34].mxu1 }
 0x64a   :  { %v2619_v4 = vpop.f32.mrb[35].mxu1 }
 0x64b   :  { %v2620_v10 = vadd.f32 %v2619_v4, %v2618_v1 }
 0x658   :  { %v2521_v2 = vpop.f32.mrb[34].mxu0 }
 0x659   :  { %v2522_v37 = vpop.f32.mrb[35].mxu0 }
 0x65a   :  { %v2523_v13 = vadd.f32 %v2522_v37, %v2521_v2 }
 0x65c   :  { %v2524_v39 = vpop.f32.mrb[36].mxu0 }
 0x65d   :  { %v2525_v40 = vpop.f32.mrb[37].mxu0 }
 0x65e   :  { %v2526_v15 = vadd.f32 %v2525_v40, %v2524_v39 }
 0x660   :  { %v2527_v38 = vpop.f32.mrb[38].mxu0 }
 0x661   :  { %v2528_v41 = vpop.f32.mrb[39].mxu0 }
 0x662   :  { %v2529_v61 = vadd.f32 %v2528_v41, %v2527_v38 }
 0x664   :  { %v2530_v53 = vpop.f32.mrb[40].mxu0 }
 0x665   :  { %v2531_v16 = vpop.f32.mrb[41].mxu0 }
 0x666   :  { %v2532_v17 = vadd.f32 %v2531_v16, %v2530_v53 }
 0x678   :  { %v2565_v14 = vpop.f32.mrb[42].mxu0 }
 0x679   :  { %v2566_v18 = vpop.f32.mrb[43].mxu0 }
 0x67a   :  { %v2567_v19 = vadd.f32 %v2566_v18, %v2565_v14 }
 0x67c   :  { %v1969_v12 = vadd.f32 %v2567_v19, %v2523_v13  ;;  %v2568_v20 = vpop.f32.mrb[44].mxu0 }
 0x67d   :  { %v2569_v22 = vpop.f32.mrb[45].mxu0 }
 0x67e   :  { %v2112_v23 = vadd.f32 %v2611_v51, %v1969_v12  ;;  %v2570_v24 = vadd.f32 %v2569_v22, %v2568_v20 }
 0x680   :  { %v2123_v29 = vadd.f32 %v2238_v21, %v2112_v23  ;;  %v1974_v30 = vadd.f32 %v2570_v24, %v2526_v15  ;;  %v2571_v33 = vpop.f32.mrb[46].mxu0 }
 0x681   :  { %v2572_v35 = vpop.f32.mrb[47].mxu0 }
 0x682   :  { %v2239_v36 = vmul.f32 -1.442695, %v2123_v29  ;;  %v2113_v11 = vadd.f32 %v2614_v57, %v1974_v30  ;;  %v2573_v42 = vadd.f32 %v2572_v35, %v2571_v33 }
 0x684   :  { %3363 = vpow2.f32 %v2239_v36  ;;  %v2124_v43 = vadd.f32 %v2238_v21, %v2113_v11  ;;  %v1979_v45 = vadd.f32 %v2573_v42, %v2529_v61  ;;  %v2574_v46 = vpop.f32.mrb[48].mxu0 }
 0x685   :  { %v2575_v47 = vpop.f32.mrb[49].mxu0 }
 0x686   :  { %v2240_v6 = vmul.f32 -1.442695, %v2124_v43  ;;  %v2114_v26 = vadd.f32 %v2617_v9, %v1979_v45  ;;  %v2576_v28 = vadd.f32 %v2575_v47, %v2574_v46 }
 0x688   :  { %3365 = vpow2.f32 %v2240_v6  ;;  %v2125_v44 = vadd.f32 %v2238_v21, %v2114_v26  ;;  %v1984_v48 = vadd.f32 %v2576_v28, %v2532_v17 }
 0x68a   :  { %v2241_v5 = vmul.f32 -1.442695, %v2125_v44  ;;  %v2115_v49 = vadd.f32 %v2620_v10, %v1984_v48 }
 0x68c   :  { %3367 = vpow2.f32 %v2241_v5  ;;  %v2126_v50 = vadd.f32 %v2238_v21, %v2115_v49 }
 0x68e   :  { %v3364_v52 = vpop.eup %3363  ;;  %v2242_v54 = vmul.f32 -1.442695, %v2126_v50 }
 0x68f   :  { %v2139_v55 = vadd.f32 1.0, %v3364_v52 }
 0x690   :  { %3369 = vpow2.f32 %v2242_v54 }
 0x691   :  { %3371 = vrcp.f32 %v2139_v55 }
 0x692   :  { %v3366_v56 = vpop.eup %3365 }
 0x693   :  { %v2140_v58 = vadd.f32 1.0, %v3366_v56 }
 0x695   :  { %3373 = vrcp.f32 %v2140_v58 }
 0x696   :  { %v3368_v0 = vpop.eup %3367 }
 0x697   :  { %v2141_v59 = vadd.f32 1.0, %v3368_v0 }
 0x699   :  { %3375 = vrcp.f32 %v2141_v59 }
 0x69a   :  { %v3370_v60 = vpop.eup %3369 }
 0x69b   :  { %v3372_v62 = vpop.eup %3371  ;;  %v2142_v3 = vadd.f32 1.0, %v3370_v60 }
 0x69c   :  { %2151 = vst [vmem:[%s4296_s15] sm:$0xff] %v3372_v62 }
 0x69d   :  { %3377 = vrcp.f32 %v2142_v3 }
 0x69f   :  { %v3374_v7 = vpop.eup %3373 }
 0x6a0   :  { %2152 = vst [vmem:[%s4296_s15 + $0x8] sm:$0xff] %v3374_v7 }
 0x6a3   :  { %v3376_v8 = vpop.eup %3375 }
 0x6a4   :  { %2153 = vst [vmem:[%s4296_s15 + $0x10] sm:$0xff] %v3376_v8 }
 0x6a7   :  { %v3378_v25 = vpop.eup %3377 }
 0x6a8   :  { %2154 = vst [vmem:[%s4296_s15 + $0x18] sm:$0xff] %v3378_v25 }
 0x6a9   :  { %2159 = vsyncpa [#allocation7], 1 }
 0x6aa   :  { %2160 = vsyncpa [#allocation9], 1 }
 0x6ab   :  { %2161 = vsyncpa [#allocation12], 1 }
 0x6ac   :  { %2162 = vsyncpa [#allocation15], 1 }

</bundles_post_ra>
